<compile_context>
chip_gen: v7x
topology: tpu7x:2x2x1
jax: 0.10.0
libtpu: 0.0.40
codegen_flags: <defaults>
</compile_context>

<pallas_src>
import functools

import jax
import jax.numpy as jnp
from jax.experimental import pallas as pl
from jax.experimental.pallas import tpu as pltpu


_LANES = 128                       # vreg lane width (last slab dim)
_MIB = 1024 * 1024
_SMALL_FALLBACK_BYTES = 512 * 1024  # below this, plain XLA wins


def _make_elementwise_kernel(func):
    """Kernel body: apply `func` elementwise to the current tile."""

    def kernel(x_ref, o_ref):
        o_ref[...] = func(x_ref[...]).astype(o_ref.dtype)

    return kernel


@functools.lru_cache(maxsize=1)
def _tpu_plan():
    """Generation-aware (block_bytes, min_grid_steps, vmem_limit, core_parallel)."""
    kind = ""
    try:
        kind = jax.devices()[0].device_kind.lower()
    except Exception:
        pass
    if "v7" in kind:
        # 2 TCs, 64 MiB VMEM/TC, ~3.2 TB/s HBM: big blocks, shard across cores.
        # 4 x 8 MiB double-buffered I/O = 32 MiB + headroom = 40 MiB scoped VMEM.
        return 8 * _MIB, 4, 40 * _MIB, True
    if "v2" in kind or "v3" in kind or "v4" in kind or "v5" in kind:
        # ~0.8 TB/s: 2 MiB blocks already put the ~0.35us/step cost at <7%;
        # keep the double-buffered footprint small for the 16 MiB scoped default.
        return 2 * _MIB, 2, 32 * _MIB, False
    # v6e (or unknown): ~86% of HBM roofline at 4 MiB tiles, ample 128 MiB VMEM.
    return 4 * _MIB, 2, 32 * _MIB, False


def _sublane_packing(itemsize):
    # Rows per natively-packed vreg tile: f32 -> 8, bf16 -> 16, int8/fp8 -> 32.
    return max(8, 32 // max(1, itemsize))


def _choose_row_tile(rows, in_item, out_item, target_block_bytes, min_steps):
    """Row tile: ~target-sized blocks, packed-vreg aligned, >= min_steps blocks
    when the slab is large enough, one full-extent block otherwise."""
    packing = _sublane_packing(min(in_item, out_item))
    widest = max(in_item, out_item)
    target_rows = max(
        packing,
        (target_block_bytes // (_LANES * widest)) // packing * packing,
    )
    per_step = -(-rows // min_steps)                 # cdiv(rows, min_steps)
    per_step = -(-per_step // packing) * packing     # round up to packed tile
    tile = min(target_rows, max(packing, per_step))
    if tile >= rows:
        # Full-extent block dim is always legal regardless of (8,128) rules.
        tile = rows
    return tile


class PallasLambda:
    """JAX/Pallas equivalent of `Lambda(nn.Module)` for elementwise `func`."""

    _core_parallel_ok = True       # flipped off once if CORE_PARALLEL rejects
    _core_parallel_checked = False

    def __init__(self, func):
        # TODO(synk): `func` is assumed elementwise; shape-changing or
        # cross-element funcs (softmax, norms, reductions, ...) fall back to
        # plain XLA below rather than being faked inside the kernel.
        self.func = func
        self._kernel = _make_elementwise_kernel(func)

    # ---- Pallas fast path on a lane-dense (rows, 128) slab ----------------
    def _pallas_slab(self, slab, out_dtype):
        rows = slab.shape[0]
        in_item = jnp.dtype(slab.dtype).itemsize
        out_item = jnp.dtype(out_dtype).itemsize
        block_bytes, min_steps, vmem_limit, want_core_parallel = _tpu_plan()

        row_tile = _choose_row_tile(rows, in_item, out_item, block_bytes, min_steps)
        grid = (pl.cdiv(rows, row_tile),)

        try:
            cost = pl.estimate_cost(self.func, slab)
        except Exception:
            cost = pl.CostEstimate(
                flops=int(slab.size),
                transcendentals=0,
                bytes_accessed=int(slab.size) * (in_item + out_item),
            )

        def call(semantics):
            return pl.pallas_call(
                self._kernel,
                out_shape=jax.ShapeDtypeStruct(slab.shape, out_dtype),
                grid=grid,
                in_specs=[pl.BlockSpec((row_tile, _LANES), lambda i: (i, 0))],
                out_specs=pl.BlockSpec((row_tile, _LANES), lambda i: (i, 0)),
                compiler_params=pltpu.CompilerParams(
                    dimension_semantics=semantics,
                    vmem_limit_bytes=vmem_limit,
                ),
                cost_estimate=cost,
            )(slab)

        if want_core_parallel and grid[0] >= 2 and PallasLambda._core_parallel_ok:
            try:
                out = call((pltpu.CORE_PARALLEL,))
                if not PallasLambda._core_parallel_checked:
                    jax.block_until_ready(out)   # surface compile issues here
                    PallasLambda._core_parallel_checked = True
                return out
            except Exception:
                PallasLambda._core_parallel_ok = False
        return call((pltpu.PARALLEL,))

    # ---- Lambda.forward ----------------------------------------------------
    def __call__(self, x):
        func = self.func

        # Preserve Lambda semantics: only shape-preserving funcs take the
        # Pallas elementwise fast path; anything else runs as plain XLA.
        try:
            out_struct = jax.eval_shape(func, x)
        except Exception:
            return func(x)
        if tuple(getattr(out_struct, "shape", ())) != tuple(x.shape):
            return func(x)
        out_dtype = out_struct.dtype

        n = x.size
        in_item = jnp.dtype(x.dtype).itemsize
        if n * in_item < _SMALL_FALLBACK_BYTES:
            # Custom-call + pipeline prime/drain dominates tiny inputs.
            return func(x)

        flat = jnp.ravel(x)                 # metadata-only for default layout
        tail = n % _LANES
        aligned = n - tail
        if aligned == 0:
            return func(x)

        if tail == 0:
            slab = flat.reshape(n // _LANES, _LANES)      # metadata-only
            out = self._pallas_slab(slab, out_dtype)
            return out.reshape(x.shape)

        # Rare non-lane-aligned path: Pallas on the 128-aligned prefix, the
        # (<128-element) tail in plain XLA.  No full-tensor pad/concat on input.
        slab = flat[:aligned].reshape(aligned // _LANES, _LANES)
        out_prefix = self._pallas_slab(slab, out_dtype).reshape(-1)
        out_tail = func(flat[aligned:]).astype(out_dtype)
        return jnp.concatenate([out_prefix, out_tail]).reshape(x.shape)


if __name__ == "__main__":
    # Example `func`: SiLU (x * sigmoid(x)) — a typical elementwise lambda.
    func = lambda x: x * jax.nn.sigmoid(x)
    lam = PallasLambda(func)

    key = jax.random.PRNGKey(0)
    k1, k2 = jax.random.split(key)

    # Small NCHW input consistent with the module (hits the XLA fast fallback).
    x_small = jax.random.normal(key, (2, 4, 16, 16), dtype=jnp.float32)
    y_small = jax.block_until_ready(lam(x_small))
    assert y_small.shape == x_small.shape and y_small.dtype == x_small.dtype
    assert jnp.allclose(y_small, func(x_small), atol=1e-5, rtol=1e-5)

    # Larger lane-aligned input: exercises the Pallas path with >=2 blocks.
    x_big = jax.random.normal(k1, (4, 16, 64, 64), dtype=jnp.float32)  # 1 MiB
    y_big = jax.block_until_ready(lam(x_big))
    assert y_big.shape == x_big.shape and y_big.dtype == x_big.dtype
    assert jnp.allclose(y_big, func(x_big), atol=1e-5, rtol=1e-5)

    # Non-lane-aligned input: Pallas on the aligned prefix + tiny XLA tail.
    x_odd = jax.random.normal(k2, (257, 515), dtype=jnp.float32)
    y_odd = jax.block_until_ready(lam(x_odd))
    assert y_odd.shape == x_odd.shape and y_odd.dtype == x_odd.dtype
    assert jnp.allclose(y_odd, func(x_odd), atol=1e-5, rtol=1e-5)

    print("KERNEL_OK")
</pallas_src>

<mosaic_0001>
module attributes {stable_mosaic.version = 11 : i64} {
  func.func @kernel(%arg0: i32, %arg1: memref<1024x128xf32, #tpu.memory_space<vmem>>, %arg2: memref<1024x128xf32, #tpu.memory_space<vmem>>) attributes {dimension_semantics = [#tpu.dimension_semantics<parallel>], iteration_bounds = array<i64: 2>, scalar_prefetch = 0 : i64, scratch_operands = 0 : i64, tpu.core_type = #tpu.core_type<tc>, window_params = [{transform_indices = @transform_0, window_bounds = array<i64: 1024, 128>}, {transform_indices = @transform_1, window_bounds = array<i64: 1024, 128>}]} {
    %c0 = arith.constant 0 : index
    %c0_0 = arith.constant 0 : index
    %0 = vector.load %arg1[%c0, %c0_0] : memref<1024x128xf32, #tpu.memory_space<vmem>>, vector<1024x128xf32>
    %1 = arith.negf %0 : vector<1024x128xf32>
    %2 = math.exp %1 : vector<1024x128xf32>
    %cst = arith.constant 1.000000e+00 : f32
    %3 = vector.broadcast %cst : f32 to vector<1024x128xf32>
    %4 = arith.addf %3, %2 : vector<1024x128xf32>
    %5 = arith.divf %3, %4 : vector<1024x128xf32>
    %6 = arith.mulf %0, %5 : vector<1024x128xf32>
    %c0_1 = arith.constant 0 : index
    %c0_2 = arith.constant 0 : index
    %7 = vector.load %arg2[%c0_1, %c0_2] : memref<1024x128xf32, #tpu.memory_space<vmem>>, vector<1024x128xf32>
    tpu.vector_store %arg2[%c0_1, %c0_2], %6 {strides = array<i32>} : memref<1024x128xf32, #tpu.memory_space<vmem>>, vector<1024x128xf32>,
    return
  }
  func.func @transform_0(%arg0: i32) -> (i32, i32) {
    %c0_i32 = arith.constant 0 : i32
    %c0_i32_0 = arith.constant 0 : i32
    return %arg0, %c0_i32 : i32, i32
  }
  func.func @transform_1(%arg0: i32) -> (i32, i32) {
    %c0_i32 = arith.constant 0 : i32
    %c0_i32_0 = arith.constant 0 : i32
    return %arg0, %c0_i32 : i32, i32
  }
}

</mosaic_0001>

<bundles_post_ra>
// kernel: tpu_custom_call.1
= control target key start
LH: loop header
LB: loop body
LE: loop exit
PB: predicated region body
PF: predicated region fallthrough
CT: control target
= control target key end

     0   :  { %6 = vsyncpa [#allocation3], 0  ;;  %s3135_s0 = inlined_call_operand.hbm [shape: f32[2048,128], index: 0, kind: input, shape index: {}]   ;;  %s3136_s1 = inlined_call_operand.hbm [shape: f32[2048,128], index: 1, kind: output, shape index: {}]  }
   0x1   :  { %8 = vsyncpa [#allocation3 + $0x1], 0 }
   0x2   :  { %9 = vsyncpa [#allocation4], 0 }
   0x3   :  { %11 = vsyncpa [#allocation4 + $0x1], 0  ;;  %s2196_s6 = smov 0   ;;  %s2198_s7 = smov 0  }
   0x4   :  { %s2200_s8 = smov 0   ;;  %s2202_s9 = smov 0  }
   0x5 LB: > { %s2217_s10 = sadd.s32 4294967295, %s2178_s9   ;;  %s1376_s11 = sadd.s32 4294967294, %s2178_s9   ;;  %s2178_s9 = sphi %s2202_s9, %s3149_s9   ;;  %s2174_s8 = sphi %s2200_s8, %s3148_s8   ;;  %s2170_s7 = sphi %s2198_s7, %s3147_s7   ;;  %s2166_s6 = sphi %s2196_s6, %s3146_s6  }
   0x6   : > { %s2221_s12 = sadd.s32 1, %s2178_s9   ;;  %s24_s13 = sadd.s32 1, %s2174_s8 }
   0x7   : > { %s21_s14 = ssub.s32 %s2178_s9, %s2221_s12  ;;  %p31_p0 = scmp.ne.s32.totalorder %s2174_s8, %s2170_s7 }
   0x8   : > { %p22_p1 = scmp.eq.s32.totalorder %s21_s14, 0  ;;  %p32_p2 = scmp.eq.s32.totalorder %s2178_s9, 0 }
   0x9   : > { %p37_p3 = scmp.ne.s32.totalorder %s2170_s7, %s2166_s6  ;;  %p38_p4 = scmp.eq.s32.totalorder %s2217_s10, 0 }
   0xa   : > { %s2233_s15 = scalar_select %p22_p1, %s2174_s8, %s24_s13  }
   0xb   : > { %p2235_p5 = por %p32_p2, %p31_p0  ;;  %p2239_p6 = por %p38_p4, %p37_p3 }
   0xc   : > { %p61_p7 = scmp.eq.s32.totalorder %s2217_s10, 1  ;;  %p67_p8 = scmp.eq.s32.totalorder %s1376_s11, 1 }
   0xd   : > { %p1532_p10 = scmp.lt.s32.totalorder %s2178_s9, 2  ;;  %s87_s20 = sand.u32 1, %s2174_s8  }
   0xe   : > { %p2246_p11 = por %p61_p7, %p31_p0  ;;  %p2250_p12 = por %p67_p8, %p37_p3 }
   0xf   : > { %s1518_s21 = sshll.u32 %s2178_s9, 14  ;;  %s1379_s22 = sshll.u32 %s87_s20, 10 }
  0x10   : > { %s3140_s18 = scalar_select %p2246_p11, 1, 0 }
  0x11   : > { %s3141_s19 = scalar_select %p2250_p12, 1, 0 }
  0x12   : > { %s2259_s25 = scalar_lea.hbm %s3135_s0, %s1518_s21  ;;  %s91_s26 = scalar_lea.vmem [#allocation2], %s1379_s22 }
  0x13   : > { %s98_s27 = sshll.u32 %s91_s26, 4  ;;  %p2263_p13 = pnand %p1532_p10, %p2235_p5  ;;  %s2267_s27 = int_to_ptr.vmem [resolvable:$true] %s98_s27 }
  0x14   : > { %s2269_s29 = scalar_lea.sflag [#allocation3], %s87_s20  ;;  %s2082_s30 = scalar_lea.hbm %s2259_s25, 16384 }
  0x15   : > { %p2083_p0 = scmp.ne.s32.totalorder %s2259_s25, %s2082_s30  ;;  %p2084_p1 = pneg %p2263_p13 }
  0x16   : > { %s2087_s4 = scalar_lea.hbm %s3135_s0, 32768  ;;  %p2088_p4 = scmp.lt.u32.totalorder %s2259_s25, %s3135_s0 }
  0x17   : > { %p2085_p2 = pnand %p2084_p1, %p2083_p0  ;;  %p2089_p5 = scmp.lt.u32.totalorder %s2087_s4, %s2082_s30 }
  0x18   : > { %p2091_p8 = scmp.lt.u32.totalorder %s2082_s30, %s2259_s25 }
  0x19   : > { %p2086_p3 = pneg %p2085_p2  ;;  %p2090_p7 = por %p2089_p5, %p2088_p4 }
  0x1b   : > { %p2092_p10 = por %p2091_p8, %p2090_p7 }
  0x1d   : > { %p2093_p9 = pnand %p2092_p10, %p2086_p3 }
  0x1f   : > { %2096 = shalt.err (!%p2093_p9)
}
  0x20   : > { %s2097_s13 = scalar_lea.vmem %s2267_s27, 16384  ;;  %s2180_s14 = smov [#allocation2]  }
  0x21   : > { %p2098_p0 = scmp.ne.s32.totalorder %s2267_s27, %s2097_s13  ;;  %s2102_s16 = sshll.u32 %s2180_s14, 4  ;;  %s2103_s16 = int_to_ptr.vmem [resolvable:$false] %s2102_s16 }
  0x22   : > { %s2104_s20 = scalar_lea.vmem %s2103_s16, 32768  ;;  %p2105_p11 = scmp.lt.s32.totalorder %s2267_s27, %s2103_s16 }
  0x23   : > { %p2100_p2 = pnand %p2098_p0, %p2084_p1  ;;  %p2106_p4 = scmp.lt.s32.totalorder %s2104_s20, %s2097_s13 }
  0x25   : > { %p2101_p12 = pneg %p2100_p2  ;;  %p2107_p5 = por %p2106_p4, %p2105_p11 }
  0x27   : > { %p2108_p7 = pnand %p2107_p5, %p2101_p12 }
  0x29   : > { %2111 = shalt.err (!%p2108_p7)
}
  0x2a   : > { %s2181_s21 = smov 128   ;;  %s2182_s22 = smov 8  }
  0x2b   : > { %1527 = dma.hbm_to_vmem [thread:$0]  (!%p2263_p13), %s2259_s25, 16384, %s2267_s27, %s2269_s29, %s2181_s21, %s2181_s21, %s2182_s22  }
  0x2c   : > { %p1382_p9 = scmp.ge.s32.totalorder %s2178_s9, 1  ;;  %p106_p1 = scmp.lt.s32.totalorder %s2178_s9, 3 }
  0x2e   : > { %p107_p3 = pnand %p1382_p9, %p106_p1 }
  0x2f   : > { %s2300_s23 = sand.u32 (!%p107_p3), 1, %s2170_s7  }
  0x30   : > { %110 = sbr.rel (%p107_p3) target bundleno = 344 (0x158), region = 24  ;;  %s1383_s24 = sshll.u32 (!%p107_p3), %s2300_s23, 10 }
  0x31   : > { %s113_s26 = scalar_lea.sflag (!%p107_p3), [#allocation3], %s2300_s23  ;;  %s2306_s30 = scalar_lea.vmem (!%p107_p3), [#allocation2], %s1383_s24 }
  0x37   : > { %2157 = dma.done.wait (%p2239_p6), %s113_s26, 16384  }
  0x38   : > { %2159 = vsyncadd (%p2239_p6), %s113_s26, 4294950912  ;;  %v2313_v0 = vld [vmem:[%s2306_s30] sm:$0xff]  ;;  %v2316_v1 = vld [vmem:[%s2306_s30 + $0x8] sm:$0xff]  ;;  %s2393_s17 = scalar_lea.vmem [#allocation5], %s1383_s24  ;;  %s1519_s25 = sshll.u32 %s2217_s10, 14 }
  0x39   : > { %v2319_v2 = vld [vmem:[%s2306_s30 + $0x10] sm:$0xff]  ;;  %v1385_v3 = vmul.f32 -1.442695, %v2313_v0  ;;  %v1386_v4 = vmul.f32 -1.442695, %v2316_v1  ;;  %v2325_v6 = vld [vmem:[%s2306_s30 + $0x18] sm:$0xff]  ;;  %s3085_s10 = scalar_lea.hbm %s3136_s1, %s1519_s25 }
  0x3a   : > { %v1387_v5 = vmul.f32 -1.442695, %v2319_v2  ;;  %v2328_v7 = vld [vmem:[%s2306_s30 + $0x20] sm:$0xff]  ;;  %v2331_v8 = vld [vmem:[%s2306_s30 + $0x28] sm:$0xff]  ;;  %v1388_v9 = vmul.f32 -1.442695, %v2325_v6 }
  0x3b   : > { %1570 = vpow2.f32 %v1385_v3  ;;  %v1389_v10 = vmul.f32 -1.442695, %v2328_v7  ;;  %v1390_v11 = vmul.f32 -1.442695, %v2331_v8  ;;  %v2337_v12 = vld [vmem:[%s2306_s30 + $0x30] sm:$0xff]  ;;  %v2340_v13 = vld [vmem:[%s2306_s30 + $0x38] sm:$0xff] }
  0x3c   : > { %1572 = vpow2.f32 %v1386_v4  ;;  %v2343_v14 = vld [vmem:[%s2306_s30 + $0x40] sm:$0xff]  ;;  %v1391_v15 = vmul.f32 -1.442695, %v2337_v12  ;;  %v1392_v16 = vmul.f32 -1.442695, %v2340_v13  ;;  %v2348_v17 = vld [vmem:[%s2306_s30 + $0x48] sm:$0xff] }
  0x3d   : > { %1574 = vpow2.f32 %v1387_v5  ;;  %v2351_v18 = vld [vmem:[%s2306_s30 + $0x50] sm:$0xff]  ;;  %v1393_v19 = vmul.f32 -1.442695, %v2343_v14  ;;  %v2355_v20 = vld [vmem:[%s2306_s30 + $0x58] sm:$0xff]  ;;  %v1394_v21 = vmul.f32 -1.442695, %v2348_v17 }
  0x3e   : > { %1576 = vpow2.f32 %v1388_v9  ;;  %v2359_v22 = vld [vmem:[%s2306_s30 + $0x60] sm:$0xff]  ;;  %v1395_v23 = vmul.f32 -1.442695, %v2351_v18  ;;  %v1396_v24 = vmul.f32 -1.442695, %v2355_v20  ;;  %v2365_v45 = vld [vmem:[%s2306_s30 + $0x68] sm:$0xff] }
  0x3f   : > { %1578 = vpow2.f32 %v1389_v10  ;;  %v1397_v25 = vmul.f32 -1.442695, %v2359_v22  ;;  %v2368_v48 = vld [vmem:[%s2306_s30 + $0x70] sm:$0xff]  ;;  %v2371_v51 = vld [vmem:[%s2306_s30 + $0x78] sm:$0xff]  ;;  %v1398_v54 = vmul.f32 -1.442695, %v2365_v45 }
  0x40   : > { %1580 = vpow2.f32 %v1390_v11  ;;  %v2375_v55 = vld [vmem:[%s2306_s30 + $0x80] sm:$0xff]  ;;  %v1399_v58 = vmul.f32 -1.442695, %v2368_v48  ;;  %v2379_v59 = vld [vmem:[%s2306_s30 + $0x88] sm:$0xff]  ;;  %v1400_v62 = vmul.f32 -1.442695, %v2371_v51 }
  0x41   : > { %1582 = vpow2.f32 %v1391_v15  ;;  %v2384_v63 = vld [vmem:[%s2306_s30 + $0x90] sm:$0xff]  ;;  %v1401_v5 = vmul.f32 -1.442695, %v2375_v55  ;;  %v2389_v9 = vld [vmem:[%s2306_s30 + $0x98] sm:$0xff]  ;;  %v2399_v11 = vld [vmem:[%s2306_s30 + $0xa0] sm:$0xff]  ;;  %s1303_s27 = sshll.u32 %s2393_s17, 4  ;;  %s3087_s27 = int_to_ptr.vmem [resolvable:$true] %s1303_s27 }
  0x42   : > { %1584 = vpow2.f32 %v1392_v16  ;;  %s1290_s2 = scalar_lea.sflag [#allocation4], %s2300_s23  ;;  %s2112_s3 = scalar_lea.vmem %s3087_s27, 16384 }
  0x43   : > { %1586 = vpow2.f32 %v1393_v19  ;;  %v1403_v19 = vmul.f32 -1.442695, %v2384_v63  ;;  %p2113_p6 = scmp.ne.s32.totalorder %s3087_s27, %s2112_s3  ;;  %p3143_p11 = scmp.ne.s32.totalorder %s3140_s18, 0 }
  0x44   : > { %1588 = vpow2.f32 %v1394_v21  ;;  %v2405_v21 = vld [vmem:[%s2306_s30 + $0xa8] sm:$0xff]  ;;  %s2183_s4 = smov [#allocation5]  }
  0x45   : > { %v1571_v26 = vpop.eup %1570  ;;  %1590 = vpow2.f32 %v1395_v23  ;;  %p2114_p12 = pnand %p2113_p6, %p3143_p11  ;;  %s2116_s5 = sshll.u32 %s2183_s4, 4  ;;  %s2117_s5 = int_to_ptr.vmem [resolvable:$false] %s2116_s5 }
  0x46   : > { %v1573_v27 = vpop.eup %1572  ;;  %v649_v28 = vadd.f32 1.0, %v1571_v26  ;;  %1592 = vpow2.f32 %v1396_v24  ;;  %v1404_v24 = vmul.f32 -1.442695, %v2389_v9  ;;  %s2118_s11 = scalar_lea.vmem %s2117_s5, 32768  ;;  %p2119_p8 = scmp.lt.s32.totalorder %s3087_s27, %s2117_s5 }
  0x47   : > { %v1575_v29 = vpop.eup %1574  ;;  %v650_v30 = vadd.f32 1.0, %v1573_v27  ;;  %1594 = vpow2.f32 %v1397_v25  ;;  %v2411_v25 = vld [vmem:[%s2306_s30 + $0xb0] sm:$0xff]  ;;  %v1405_v27 = vmul.f32 -1.442695, %v2399_v11  ;;  %p2115_p13 = pneg %p2114_p12  ;;  %p2120_p10 = scmp.lt.s32.totalorder %s2118_s11, %s2112_s3 }
  0x48   : > { %v1577_v31 = vpop.eup %1576  ;;  %1596 = vrcp.f32 %v649_v28  ;;  %v651_v32 = vadd.f32 1.0, %v1575_v29  ;;  %v2417_v28 = vld [vmem:[%s2306_s30 + $0xb8] sm:$0xff] }
  0x49   : > { %v1579_v33 = vpop.eup %1578  ;;  %1598 = vrcp.f32 %v650_v30  ;;  %v652_v34 = vadd.f32 1.0, %v1577_v31  ;;  %v1406_v30 = vmul.f32 -1.442695, %v2405_v21  ;;  %v2423_v31 = vld [vmem:[%s2306_s30 + $0xc0] sm:$0xff]  ;;  %p2121_p0 = por %p2120_p10, %p2119_p8 }
  0x4a   : > { %v1581_v35 = vpop.eup %1580  ;;  %1600 = vrcp.f32 %v651_v32  ;;  %v653_v36 = vadd.f32 1.0, %v1579_v33  ;;  %v1407_v33 = vmul.f32 -1.442695, %v2411_v25 }
  0x4b   : > { %v1583_v37 = vpop.eup %1582  ;;  %1602 = vrcp.f32 %v652_v34  ;;  %v654_v38 = vadd.f32 1.0, %v1581_v35  ;;  %v2429_v34 = vld [vmem:[%s2306_s30 + $0xc8] sm:$0xff]  ;;  %p2122_p2 = pnand %p2121_p0, %p2115_p13 }
  0x4c   : > { %v1585_v39 = vpop.eup %1584  ;;  %1604 = vrcp.f32 %v653_v36  ;;  %v655_v40 = vadd.f32 1.0, %v1583_v37  ;;  %v1408_v36 = vmul.f32 -1.442695, %v2417_v28 }
  0x4d   : > { %v1587_v41 = vpop.eup %1586  ;;  %1606 = vrcp.f32 %v654_v38  ;;  %v656_v42 = vadd.f32 1.0, %v1585_v39 }
  0x4e   : > { %v1589_v43 = vpop.eup %1588  ;;  %1608 = vrcp.f32 %v655_v40  ;;  %v657_v44 = vadd.f32 1.0, %v1587_v41 }
  0x4f   : > { %v1591_v46 = vpop.eup %1590  ;;  %1610 = vrcp.f32 %v656_v42  ;;  %v658_v47 = vadd.f32 1.0, %v1589_v43 }
  0x50   : > { %v1593_v49 = vpop.eup %1592  ;;  %1612 = vrcp.f32 %v657_v44  ;;  %v659_v50 = vadd.f32 1.0, %v1591_v46 }
  0x51   : > { %v1595_v52 = vpop.eup %1594  ;;  %1614 = vrcp.f32 %v658_v47  ;;  %v660_v53 = vadd.f32 1.0, %v1593_v49 }
  0x52   : > { %v1597_v56 = vpop.eup %1596  ;;  %1616 = vrcp.f32 %v659_v50  ;;  %v661_v57 = vadd.f32 1.0, %v1595_v52 }
  0x53   : > { %v1599_v60 = vpop.eup %1598  ;;  %v1033_v61 = vmul.f32 %v1597_v56, %v2313_v0  ;;  %1618 = vrcp.f32 %v660_v53 }
  0x54   : > { %v1601_v3 = vpop.eup %1600  ;;  %v1034_v4 = vmul.f32 %v1599_v60, %v2316_v1  ;;  %1620 = vrcp.f32 %v661_v57  ;;  %v1402_v1 = vmul.f32 -1.442695, %v2379_v59 }
  0x55   : > { %v1603_v10 = vpop.eup %1602  ;;  %1161 = vst [vmem:[%s2393_s17] sm:$0xff] %v1033_v61  ;;  %v1035_v0 = vmul.f32 %v1601_v3, %v2319_v2  ;;  %1622 = vpow2.f32 %v1398_v54 }
  0x56   : > { %v1605_v15 = vpop.eup %1604  ;;  %1162 = vst [vmem:[%s2393_s17 + $0x8] sm:$0xff] %v1034_v4  ;;  %v1036_v16 = vmul.f32 %v1603_v10, %v2325_v6  ;;  %1624 = vpow2.f32 %v1399_v58  ;;  %v2447_v4 = vld [vmem:[%s2306_s30 + $0xd0] sm:$0xff] }
  0x57   : > { %v1607_v23 = vpop.eup %1606  ;;  %1163 = vst [vmem:[%s2393_s17 + $0x10] sm:$0xff] %v1035_v0  ;;  %v1037_v2 = vmul.f32 %v1605_v15, %v2328_v7  ;;  %1626 = vpow2.f32 %v1400_v62  ;;  %v2450_v0 = vld [vmem:[%s2306_s30 + $0xd8] sm:$0xff] }
  0x58   : > { %v1609_v26 = vpop.eup %1608  ;;  %1164 = vst [vmem:[%s2393_s17 + $0x18] sm:$0xff] %v1036_v16  ;;  %v1038_v6 = vmul.f32 %v1607_v23, %v2331_v8  ;;  %1628 = vpow2.f32 %v1401_v5  ;;  %v2453_v16 = vld [vmem:[%s2306_s30 + $0xe0] sm:$0xff] }
  0x59   : > { %v1611_v29 = vpop.eup %1610  ;;  %1165 = vst [vmem:[%s2393_s17 + $0x20] sm:$0xff] %v1037_v2  ;;  %v1039_v7 = vmul.f32 %v1609_v26, %v2337_v12  ;;  %1630 = vpow2.f32 %v1402_v1  ;;  %v1411_v2 = vmul.f32 -1.442695, %v2447_v4 }
  0x5a   : > { %v1613_v32 = vpop.eup %1612  ;;  %1166 = vst [vmem:[%s2393_s17 + $0x28] sm:$0xff] %v1038_v6  ;;  %v1040_v8 = vmul.f32 %v1611_v29, %v2340_v13  ;;  %1632 = vpow2.f32 %v1403_v19  ;;  %v1409_v13 = vmul.f32 -1.442695, %v2423_v31  ;;  %v2461_v29 = vld [vmem:[%s2306_s30 + $0xf0] sm:$0xff] }
  0x5b   : > { %v1615_v35 = vpop.eup %1614  ;;  %1167 = vst [vmem:[%s2393_s17 + $0x30] sm:$0xff] %v1039_v7  ;;  %v1041_v12 = vmul.f32 %v1613_v32, %v2343_v14  ;;  %1634 = vpow2.f32 %v1404_v24  ;;  %v1410_v14 = vmul.f32 -1.442695, %v2429_v34  ;;  %v2457_v24 = vld [vmem:[%s2306_s30 + $0xe8] sm:$0xff]  ;;  %v1413_v32 = vmul.f32 -1.442695, %v2453_v16 }
  0x5c   : > { %v1617_v37 = vpop.eup %1616  ;;  %1168 = vst [vmem:[%s2393_s17 + $0x38] sm:$0xff] %v1040_v8  ;;  %v1042_v38 = vmul.f32 %v1615_v35, %v2348_v17  ;;  %1636 = vpow2.f32 %v1405_v27  ;;  %v1412_v27 = vmul.f32 -1.442695, %v2450_v0  ;;  %v2466_v8 = vld [vmem:[%s2306_s30 + $0xf8] sm:$0xff] }
  0x5d   : > { %v1619_v39 = vpop.eup %1618  ;;  %1169 = vst [vmem:[%s2393_s17 + $0x40] sm:$0xff] %v1041_v12  ;;  %v1043_v40 = vmul.f32 %v1617_v37, %v2351_v18  ;;  %1638 = vpow2.f32 %v1406_v30  ;;  %v1414_v12 = vmul.f32 -1.442695, %v2457_v24 }
  0x5e   : > { %v1621_v41 = vpop.eup %1620  ;;  %1170 = vst [vmem:[%s2393_s17 + $0x48] sm:$0xff] %v1042_v38  ;;  %v1044_v42 = vmul.f32 %v1619_v39, %v2355_v20  ;;  %1640 = vpow2.f32 %v1407_v33  ;;  %v1415_v38 = vmul.f32 -1.442695, %v2461_v29 }
  0x5f   : > { %v1623_v43 = vpop.eup %1622  ;;  %1171 = vst [vmem:[%s2393_s17 + $0x50] sm:$0xff] %v1043_v40  ;;  %v1045_v17 = vmul.f32 %v1621_v41, %v2359_v22  ;;  %1642 = vpow2.f32 %v1408_v36  ;;  %v2471_v36 = vld [vmem:[%s2306_s30 + $0x100] sm:$0xff]  ;;  %v1416_v40 = vmul.f32 -1.442695, %v2466_v8 }
  0x60   : > { %v1625_v44 = vpop.eup %1624  ;;  %1172 = vst [vmem:[%s2393_s17 + $0x58] sm:$0xff] %v1044_v42  ;;  %v662_v46 = vadd.f32 1.0, %v1623_v43  ;;  %1644 = vpow2.f32 %v1409_v13  ;;  %v2477_v13 = vld [vmem:[%s2306_s30 + $0x108] sm:$0xff]  ;;  %v1417_v42 = vmul.f32 -1.442695, %v2471_v36  ;;  %v2489_v43 = vld [vmem:[%s2306_s30 + $0x118] sm:$0xff] }
  0x61   : > { %v1627_v47 = vpop.eup %1626  ;;  %1173 = vst [vmem:[%s2393_s17 + $0x60] sm:$0xff] %v1045_v17  ;;  %v663_v18 = vadd.f32 1.0, %v1625_v44  ;;  %1646 = vpow2.f32 %v1410_v14  ;;  %v2483_v14 = vld [vmem:[%s2306_s30 + $0x110] sm:$0xff]  ;;  %v1418_v44 = vmul.f32 -1.442695, %v2477_v13 }
  0x62   : > { %v1629_v49 = vpop.eup %1628  ;;  %1648 = vrcp.f32 %v662_v46  ;;  %v664_v50 = vadd.f32 1.0, %v1627_v47  ;;  %v2495_v46 = vld [vmem:[%s2306_s30 + $0x120] sm:$0xff] }
  0x63   : > { %v1631_v52 = vpop.eup %1630  ;;  %1650 = vrcp.f32 %v663_v18  ;;  %v665_v20 = vadd.f32 1.0, %v1629_v49  ;;  %v1419_v18 = vmul.f32 -1.442695, %v2483_v14  ;;  %v2501_v49 = vld [vmem:[%s2306_s30 + $0x128] sm:$0xff] }
  0x64   : > { %v1633_v53 = vpop.eup %1632  ;;  %1652 = vrcp.f32 %v664_v50  ;;  %v666_v54 = vadd.f32 1.0, %v1631_v52  ;;  %v1420_v52 = vmul.f32 -1.442695, %v2489_v43 }
  0x65   : > { %v1635_v22 = vpop.eup %1634  ;;  %1654 = vrcp.f32 %v665_v20  ;;  %v667_v56 = vadd.f32 1.0, %v1633_v53  ;;  %v2507_v20 = vld [vmem:[%s2306_s30 + $0x130] sm:$0xff] }
  0x66   : > { %v1637_v57 = vpop.eup %1636  ;;  %1656 = vrcp.f32 %v666_v54  ;;  %v668_v58 = vadd.f32 1.0, %v1635_v22  ;;  %v1421_v54 = vmul.f32 -1.442695, %v2495_v46 }
  0x67   : > { %v1639_v60 = vpop.eup %1638  ;;  %1658 = vrcp.f32 %v667_v56  ;;  %v669_v61 = vadd.f32 1.0, %v1637_v57 }
  0x68   : > { %v1641_v62 = vpop.eup %1640  ;;  %1660 = vrcp.f32 %v668_v58  ;;  %v670_v3 = vadd.f32 1.0, %v1639_v60 }
  0x69   : > { %v1643_v5 = vpop.eup %1642  ;;  %1662 = vrcp.f32 %v669_v61  ;;  %v671_v10 = vadd.f32 1.0, %v1641_v62 }
  0x6a   : > { %v1645_v1 = vpop.eup %1644  ;;  %1664 = vrcp.f32 %v670_v3  ;;  %v672_v15 = vadd.f32 1.0, %v1643_v5 }
  0x6b   : > { %v1647_v19 = vpop.eup %1646  ;;  %1666 = vrcp.f32 %v671_v10  ;;  %v673_v23 = vadd.f32 1.0, %v1645_v1 }
  0x6c   : > { %v1649_v26 = vpop.eup %1648  ;;  %1668 = vrcp.f32 %v672_v15  ;;  %v674_v6 = vadd.f32 1.0, %v1647_v19 }
  0x6d   : > { %v1651_v7 = vpop.eup %1650  ;;  %v1046_v30 = vmul.f32 %v1649_v26, %v2365_v45  ;;  %1670 = vrcp.f32 %v673_v23 }
  0x6e   : > { %v1653_v33 = vpop.eup %1652  ;;  %v1047_v35 = vmul.f32 %v1651_v7, %v2368_v48  ;;  %1672 = vrcp.f32 %v674_v6 }
  0x6f   : > { %v1655_v37 = vpop.eup %1654  ;;  %1174 = vst [vmem:[%s2393_s17 + $0x68] sm:$0xff] %v1046_v30  ;;  %v1048_v45 = vmul.f32 %v1653_v33, %v2371_v51  ;;  %1674 = vpow2.f32 %v1411_v2 }
  0x70   : > { %v1657_v39 = vpop.eup %1656  ;;  %1175 = vst [vmem:[%s2393_s17 + $0x70] sm:$0xff] %v1047_v35  ;;  %v1049_v48 = vmul.f32 %v1655_v37, %v2375_v55  ;;  %1676 = vpow2.f32 %v1412_v27  ;;  %v2525_v35 = vld [vmem:[%s2306_s30 + $0x138] sm:$0xff] }
  0x71   : > { %v1659_v41 = vpop.eup %1658  ;;  %1176 = vst [vmem:[%s2393_s17 + $0x78] sm:$0xff] %v1048_v45  ;;  %v1050_v51 = vmul.f32 %v1657_v39, %v2379_v59  ;;  %1678 = vpow2.f32 %v1413_v32  ;;  %v2528_v45 = vld [vmem:[%s2306_s30 + $0x140] sm:$0xff] }
  0x72   : > { %v1661_v17 = vpop.eup %1660  ;;  %1177 = vst [vmem:[%s2393_s17 + $0x80] sm:$0xff] %v1049_v48  ;;  %v1051_v55 = vmul.f32 %v1659_v41, %v2384_v63  ;;  %1680 = vpow2.f32 %v1414_v12  ;;  %v2531_v48 = vld [vmem:[%s2306_s30 + $0x148] sm:$0xff] }
  0x73   : > { %v1663_v47 = vpop.eup %1662  ;;  %1178 = vst [vmem:[%s2393_s17 + $0x88] sm:$0xff] %v1050_v51  ;;  %v1052_v59 = vmul.f32 %v1661_v17, %v2389_v9  ;;  %1682 = vpow2.f32 %v1415_v38  ;;  %v1424_v51 = vmul.f32 -1.442695, %v2525_v35 }
  0x74   : > { %v1665_v50 = vpop.eup %1664  ;;  %1179 = vst [vmem:[%s2393_s17 + $0x90] sm:$0xff] %v1051_v55  ;;  %v1053_v63 = vmul.f32 %v1663_v47, %v2399_v11  ;;  %1684 = vpow2.f32 %v1416_v40  ;;  %v1422_v11 = vmul.f32 -1.442695, %v2501_v49  ;;  %v2539_v47 = vld [vmem:[%s2306_s30 + $0x158] sm:$0xff] }
  0x75   : > { %v1667_v53 = vpop.eup %1666  ;;  %1180 = vst [vmem:[%s2393_s17 + $0x98] sm:$0xff] %v1052_v59  ;;  %v1054_v9 = vmul.f32 %v1665_v50, %v2405_v21  ;;  %1686 = vpow2.f32 %v1417_v42  ;;  %v1423_v21 = vmul.f32 -1.442695, %v2507_v20  ;;  %v2535_v42 = vld [vmem:[%s2306_s30 + $0x150] sm:$0xff]  ;;  %v1426_v50 = vmul.f32 -1.442695, %v2531_v48 }
  0x76   : > { %v1669_v22 = vpop.eup %1668  ;;  %1181 = vst [vmem:[%s2393_s17 + $0xa0] sm:$0xff] %v1053_v63  ;;  %v1055_v56 = vmul.f32 %v1667_v53, %v2411_v25  ;;  %1688 = vpow2.f32 %v1418_v44  ;;  %v1425_v44 = vmul.f32 -1.442695, %v2528_v45  ;;  %v2544_v63 = vld [vmem:[%s2306_s30 + $0x160] sm:$0xff] }
  0x77   : > { %v1671_v57 = vpop.eup %1670  ;;  %1182 = vst [vmem:[%s2393_s17 + $0xa8] sm:$0xff] %v1054_v9  ;;  %v1056_v58 = vmul.f32 %v1669_v22, %v2417_v28  ;;  %1690 = vpow2.f32 %v1419_v18  ;;  %v1427_v9 = vmul.f32 -1.442695, %v2535_v42 }
  0x78   : > { %v1673_v60 = vpop.eup %1672  ;;  %1183 = vst [vmem:[%s2393_s17 + $0xb0] sm:$0xff] %v1055_v56  ;;  %v1057_v61 = vmul.f32 %v1671_v57, %v2423_v31  ;;  %1692 = vpow2.f32 %v1420_v52  ;;  %v1428_v56 = vmul.f32 -1.442695, %v2539_v47 }
  0x79   : > { %v1675_v62 = vpop.eup %1674  ;;  %1184 = vst [vmem:[%s2393_s17 + $0xb8] sm:$0xff] %v1056_v58  ;;  %v1058_v25 = vmul.f32 %v1673_v60, %v2429_v34  ;;  %1694 = vpow2.f32 %v1421_v54  ;;  %v2549_v54 = vld [vmem:[%s2306_s30 + $0x168] sm:$0xff]  ;;  %v1429_v58 = vmul.f32 -1.442695, %v2544_v63 }
  0x7a   : > { %v1677_v3 = vpop.eup %1676  ;;  %1185 = vst [vmem:[%s2393_s17 + $0xc0] sm:$0xff] %v1057_v61  ;;  %v675_v5 = vadd.f32 1.0, %v1675_v62  ;;  %1696 = vpow2.f32 %v1422_v11  ;;  %v2555_v11 = vld [vmem:[%s2306_s30 + $0x170] sm:$0xff]  ;;  %v1430_v61 = vmul.f32 -1.442695, %v2549_v54  ;;  %v2567_v62 = vld [vmem:[%s2306_s30 + $0x180] sm:$0xff] }
  0x7b   : > { %v1679_v10 = vpop.eup %1678  ;;  %1186 = vst [vmem:[%s2393_s17 + $0xc8] sm:$0xff] %v1058_v25  ;;  %v676_v28 = vadd.f32 1.0, %v1677_v3  ;;  %1698 = vpow2.f32 %v1423_v21  ;;  %v2561_v21 = vld [vmem:[%s2306_s30 + $0x178] sm:$0xff]  ;;  %v1431_v3 = vmul.f32 -1.442695, %v2555_v11 }
  0x7c   : > { %v1681_v1 = vpop.eup %1680  ;;  %1700 = vrcp.f32 %v675_v5  ;;  %v677_v15 = vadd.f32 1.0, %v1679_v10  ;;  %v2573_v5 = vld [vmem:[%s2306_s30 + $0x188] sm:$0xff] }
  0x7d   : > { %v1683_v19 = vpop.eup %1682  ;;  %1702 = vrcp.f32 %v676_v28  ;;  %v678_v31 = vadd.f32 1.0, %v1681_v1  ;;  %v1432_v28 = vmul.f32 -1.442695, %v2561_v21  ;;  %v2579_v1 = vld [vmem:[%s2306_s30 + $0x190] sm:$0xff] }
  0x7e   : > { %v1685_v23 = vpop.eup %1684  ;;  %1704 = vrcp.f32 %v677_v15  ;;  %v679_v2 = vadd.f32 1.0, %v1683_v19  ;;  %v1433_v19 = vmul.f32 -1.442695, %v2567_v62 }
  0x7f   : > { %v1687_v34 = vpop.eup %1686  ;;  %1706 = vrcp.f32 %v678_v31  ;;  %v680_v26 = vadd.f32 1.0, %v1685_v23  ;;  %v2585_v31 = vld [vmem:[%s2306_s30 + $0x198] sm:$0xff] }
  0x80   : > { %v1689_v6 = vpop.eup %1688  ;;  %1708 = vrcp.f32 %v679_v2  ;;  %v681_v27 = vadd.f32 1.0, %v1687_v34  ;;  %v1434_v2 = vmul.f32 -1.442695, %v2573_v5 }
  0x81   : > { %v1691_v7 = vpop.eup %1690  ;;  %1710 = vrcp.f32 %v680_v26  ;;  %v682_v30 = vadd.f32 1.0, %v1689_v6 }
  0x82   : > { %v1693_v32 = vpop.eup %1692  ;;  %1712 = vrcp.f32 %v681_v27  ;;  %v683_v33 = vadd.f32 1.0, %v1691_v7 }
  0x83   : > { %v1695_v12 = vpop.eup %1694  ;;  %1714 = vrcp.f32 %v682_v30  ;;  %v684_v37 = vadd.f32 1.0, %v1693_v32 }
  0x84   : > { %v1697_v38 = vpop.eup %1696  ;;  %1716 = vrcp.f32 %v683_v33  ;;  %v685_v39 = vadd.f32 1.0, %v1695_v12 }
  0x85   : > { %v1699_v40 = vpop.eup %1698  ;;  %1718 = vrcp.f32 %v684_v37  ;;  %v686_v41 = vadd.f32 1.0, %v1697_v38 }
  0x86   : > { %v1701_v17 = vpop.eup %1700  ;;  %1720 = vrcp.f32 %v685_v39  ;;  %v687_v55 = vadd.f32 1.0, %v1699_v40 }
  0x87   : > { %v1703_v59 = vpop.eup %1702  ;;  %v1059_v18 = vmul.f32 %v1701_v17, %v2447_v4  ;;  %1722 = vrcp.f32 %v686_v41 }
  0x88   : > { %v1705_v52 = vpop.eup %1704  ;;  %v1060_v53 = vmul.f32 %v1703_v59, %v2450_v0  ;;  %1724 = vrcp.f32 %v687_v55 }
  0x89   : > { %v1707_v22 = vpop.eup %1706  ;;  %1187 = vst [vmem:[%s2393_s17 + $0xd0] sm:$0xff] %v1059_v18  ;;  %v1061_v4 = vmul.f32 %v1705_v52, %v2453_v16  ;;  %1726 = vpow2.f32 %v1424_v51 }
  0x8a   : > { %v1709_v57 = vpop.eup %1708  ;;  %1188 = vst [vmem:[%s2393_s17 + $0xd8] sm:$0xff] %v1060_v53  ;;  %v1062_v0 = vmul.f32 %v1707_v22, %v2457_v24  ;;  %1728 = vpow2.f32 %v1425_v44  ;;  %v2603_v53 = vld [vmem:[%s2306_s30 + $0x1a0] sm:$0xff] }
  0x8b   : > { %v1711_v60 = vpop.eup %1710  ;;  %1189 = vst [vmem:[%s2393_s17 + $0xe0] sm:$0xff] %v1061_v4  ;;  %v1063_v16 = vmul.f32 %v1709_v57, %v2461_v29  ;;  %1730 = vpow2.f32 %v1426_v50  ;;  %v2606_v4 = vld [vmem:[%s2306_s30 + $0x1a8] sm:$0xff] }
  0x8c   : > { %v1713_v25 = vpop.eup %1712  ;;  %1190 = vst [vmem:[%s2393_s17 + $0xe8] sm:$0xff] %v1062_v0  ;;  %v1064_v24 = vmul.f32 %v1711_v60, %v2466_v8  ;;  %1732 = vpow2.f32 %v1427_v9  ;;  %v2609_v0 = vld [vmem:[%s2306_s30 + $0x1b0] sm:$0xff] }
  0x8d   : > { %v1715_v10 = vpop.eup %1714  ;;  %1191 = vst [vmem:[%s2393_s17 + $0xf0] sm:$0xff] %v1063_v16  ;;  %v1065_v29 = vmul.f32 %v1713_v25, %v2471_v36  ;;  %1734 = vpow2.f32 %v1428_v56  ;;  %v1437_v16 = vmul.f32 -1.442695, %v2603_v53 }
  0x8e   : > { %v1717_v15 = vpop.eup %1716  ;;  %1192 = vst [vmem:[%s2393_s17 + $0xf8] sm:$0xff] %v1064_v24  ;;  %v1066_v8 = vmul.f32 %v1715_v10, %v2477_v13  ;;  %1736 = vpow2.f32 %v1429_v58  ;;  %v1435_v13 = vmul.f32 -1.442695, %v2579_v1  ;;  %v2617_v10 = vld [vmem:[%s2306_s30 + $0x1c0] sm:$0xff] }
  0x8f   : > { %v1719_v23 = vpop.eup %1718  ;;  %1193 = vst [vmem:[%s2393_s17 + $0x100] sm:$0xff] %v1065_v29  ;;  %v1067_v36 = vmul.f32 %v1717_v15, %v2483_v14  ;;  %1738 = vpow2.f32 %v1430_v61  ;;  %v1436_v14 = vmul.f32 -1.442695, %v2585_v31  ;;  %v2613_v61 = vld [vmem:[%s2306_s30 + $0x1b8] sm:$0xff]  ;;  %v1439_v15 = vmul.f32 -1.442695, %v2609_v0 }
  0x90   : > { %v1721_v34 = vpop.eup %1720  ;;  %1194 = vst [vmem:[%s2393_s17 + $0x108] sm:$0xff] %v1066_v8  ;;  %v1068_v26 = vmul.f32 %v1719_v23, %v2489_v43  ;;  %1740 = vpow2.f32 %v1431_v3  ;;  %v1438_v3 = vmul.f32 -1.442695, %v2606_v4  ;;  %v2622_v8 = vld [vmem:[%s2306_s30 + $0x1c8] sm:$0xff] }
  0x91   : > { %v1723_v6 = vpop.eup %1722  ;;  %1195 = vst [vmem:[%s2393_s17 + $0x110] sm:$0xff] %v1067_v36  ;;  %v1069_v27 = vmul.f32 %v1721_v34, %v2495_v46  ;;  %1742 = vpow2.f32 %v1432_v28  ;;  %v1440_v36 = vmul.f32 -1.442695, %v2613_v61 }
  0x92   : > { %v1725_v7 = vpop.eup %1724  ;;  %1196 = vst [vmem:[%s2393_s17 + $0x118] sm:$0xff] %v1068_v26  ;;  %v1070_v30 = vmul.f32 %v1723_v6, %v2501_v49  ;;  %1744 = vpow2.f32 %v1433_v19  ;;  %v1441_v26 = vmul.f32 -1.442695, %v2617_v10 }
  0x93   : > { %v1727_v32 = vpop.eup %1726  ;;  %1197 = vst [vmem:[%s2393_s17 + $0x120] sm:$0xff] %v1069_v27  ;;  %v1071_v43 = vmul.f32 %v1725_v7, %v2507_v20  ;;  %1746 = vpow2.f32 %v1434_v2  ;;  %v2627_v2 = vld [vmem:[%s2306_s30 + $0x1d0] sm:$0xff]  ;;  %v1442_v27 = vmul.f32 -1.442695, %v2622_v8 }
  0x94   : > { %v1729_v33 = vpop.eup %1728  ;;  %1198 = vst [vmem:[%s2393_s17 + $0x128] sm:$0xff] %v1070_v30  ;;  %v688_v12 = vadd.f32 1.0, %v1727_v32  ;;  %1748 = vpow2.f32 %v1435_v13  ;;  %v2633_v13 = vld [vmem:[%s2306_s30 + $0x1d8] sm:$0xff]  ;;  %v1443_v30 = vmul.f32 -1.442695, %v2627_v2  ;;  %v2645_v32 = vld [vmem:[%s2306_s30 + $0x1e8] sm:$0xff] }
  0x95   : > { %v1731_v37 = vpop.eup %1730  ;;  %1199 = vst [vmem:[%s2393_s17 + $0x130] sm:$0xff] %v1071_v43  ;;  %v689_v46 = vadd.f32 1.0, %v1729_v33  ;;  %1750 = vpow2.f32 %v1436_v14  ;;  %v2639_v14 = vld [vmem:[%s2306_s30 + $0x1e0] sm:$0xff]  ;;  %v1444_v33 = vmul.f32 -1.442695, %v2633_v13 }
  0x96   : > { %v1733_v38 = vpop.eup %1732  ;;  %1752 = vrcp.f32 %v688_v12  ;;  %v690_v39 = vadd.f32 1.0, %v1731_v37  ;;  %v2651_v12 = vld [vmem:[%s2306_s30 + $0x1f0] sm:$0xff] }
  0x97   : > { %v1735_v40 = vpop.eup %1734  ;;  %1754 = vrcp.f32 %v689_v46  ;;  %v691_v49 = vadd.f32 1.0, %v1733_v38  ;;  %v1445_v46 = vmul.f32 -1.442695, %v2639_v14  ;;  %v2657_v38 = vld [vmem:[%s2306_s30 + $0x1f8] sm:$0xff] }
  0x98   : > { %v1737_v41 = vpop.eup %1736  ;;  %1756 = vrcp.f32 %v690_v39  ;;  %v692_v51 = vadd.f32 1.0, %v1735_v40  ;;  %v1446_v40 = vmul.f32 -1.442695, %v2645_v32 }
  0x99   : > { %v1739_v20 = vpop.eup %1738  ;;  %1758 = vrcp.f32 %v691_v49  ;;  %v693_v17 = vadd.f32 1.0, %v1737_v41  ;;  %v2663_v49 = vld [vmem:[%s2306_s30 + $0x200] sm:$0xff] }
  0x9a   : > { %v1741_v55 = vpop.eup %1740  ;;  %1760 = vrcp.f32 %v692_v51  ;;  %v694_v44 = vadd.f32 1.0, %v1739_v20  ;;  %v1447_v51 = vmul.f32 -1.442695, %v2651_v12 }
  0x9b   : > { %v1743_v59 = vpop.eup %1742  ;;  %1762 = vrcp.f32 %v693_v17  ;;  %v695_v18 = vadd.f32 1.0, %v1741_v55 }
  0x9c   : > { %v1745_v50 = vpop.eup %1744  ;;  %1764 = vrcp.f32 %v694_v44  ;;  %v696_v52 = vadd.f32 1.0, %v1743_v59 }
  0x9d   : > { %v1747_v9 = vpop.eup %1746  ;;  %1766 = vrcp.f32 %v695_v18  ;;  %v697_v22 = vadd.f32 1.0, %v1745_v50 }
  0x9e   : > { %v1749_v56 = vpop.eup %1748  ;;  %1768 = vrcp.f32 %v696_v52  ;;  %v698_v57 = vadd.f32 1.0, %v1747_v9 }
  0x9f   : > { %v1751_v58 = vpop.eup %1750  ;;  %1770 = vrcp.f32 %v697_v22  ;;  %v699_v60 = vadd.f32 1.0, %v1749_v56 }
  0xa0   : > { %v1753_v25 = vpop.eup %1752  ;;  %1772 = vrcp.f32 %v698_v57  ;;  %v700_v24 = vadd.f32 1.0, %v1751_v58 }
  0xa1   : > { %v1755_v29 = vpop.eup %1754  ;;  %v1072_v28 = vmul.f32 %v1753_v25, %v2525_v35  ;;  %1774 = vrcp.f32 %v699_v60 }
  0xa2   : > { %v1757_v19 = vpop.eup %1756  ;;  %v1073_v23 = vmul.f32 %v1755_v29, %v2528_v45  ;;  %1776 = vrcp.f32 %v700_v24 }
  0xa3   : > { %v1759_v34 = vpop.eup %1758  ;;  %1200 = vst [vmem:[%s2393_s17 + $0x138] sm:$0xff] %v1072_v28  ;;  %v1074_v35 = vmul.f32 %v1757_v19, %v2531_v48  ;;  %1778 = vpow2.f32 %v1437_v16 }
  0xa4   : > { %v1761_v6 = vpop.eup %1760  ;;  %1201 = vst [vmem:[%s2393_s17 + $0x140] sm:$0xff] %v1073_v23  ;;  %v1075_v45 = vmul.f32 %v1759_v34, %v2535_v42  ;;  %1780 = vpow2.f32 %v1438_v3  ;;  %v2681_v23 = vld [vmem:[%s2306_s30 + $0x208] sm:$0xff] }
  0xa5   : > { %v1763_v7 = vpop.eup %1762  ;;  %1202 = vst [vmem:[%s2393_s17 + $0x148] sm:$0xff] %v1074_v35  ;;  %v1076_v48 = vmul.f32 %v1761_v6, %v2539_v47  ;;  %1782 = vpow2.f32 %v1439_v15  ;;  %v2684_v35 = vld [vmem:[%s2306_s30 + $0x210] sm:$0xff] }
  0xa6   : > { %v1765_v43 = vpop.eup %1764  ;;  %1203 = vst [vmem:[%s2393_s17 + $0x150] sm:$0xff] %v1075_v45  ;;  %v1077_v42 = vmul.f32 %v1763_v7, %v2544_v63  ;;  %1784 = vpow2.f32 %v1440_v36  ;;  %v2687_v45 = vld [vmem:[%s2306_s30 + $0x218] sm:$0xff] }
  0xa7   : > { %v1767_v37 = vpop.eup %1766  ;;  %1204 = vst [vmem:[%s2393_s17 + $0x158] sm:$0xff] %v1076_v48  ;;  %v1078_v47 = vmul.f32 %v1765_v43, %v2549_v54  ;;  %1786 = vpow2.f32 %v1441_v26  ;;  %v1450_v48 = vmul.f32 -1.442695, %v2681_v23 }
  0xa8   : > { %v1769_v39 = vpop.eup %1768  ;;  %1205 = vst [vmem:[%s2393_s17 + $0x160] sm:$0xff] %v1077_v42  ;;  %v1079_v63 = vmul.f32 %v1767_v37, %v2555_v11  ;;  %1788 = vpow2.f32 %v1442_v27  ;;  %v1448_v11 = vmul.f32 -1.442695, %v2657_v38  ;;  %v2695_v37 = vld [vmem:[%s2306_s30 + $0x228] sm:$0xff] }
  0xa9   : > { %v1771_v41 = vpop.eup %1770  ;;  %1206 = vst [vmem:[%s2393_s17 + $0x168] sm:$0xff] %v1078_v47  ;;  %v1080_v54 = vmul.f32 %v1769_v39, %v2561_v21  ;;  %1790 = vpow2.f32 %v1443_v30  ;;  %v1449_v21 = vmul.f32 -1.442695, %v2663_v49  ;;  %v2691_v30 = vld [vmem:[%s2306_s30 + $0x220] sm:$0xff]  ;;  %v1452_v39 = vmul.f32 -1.442695, %v2687_v45 }
  0xaa   : > { %v1773_v20 = vpop.eup %1772  ;;  %1207 = vst [vmem:[%s2393_s17 + $0x170] sm:$0xff] %v1079_v63  ;;  %v1081_v17 = vmul.f32 %v1771_v41, %v2567_v62  ;;  %1792 = vpow2.f32 %v1444_v33  ;;  %v1451_v33 = vmul.f32 -1.442695, %v2684_v35  ;;  %v2700_v63 = vld [vmem:[%s2306_s30 + $0x230] sm:$0xff] }
  0xab   : > { %v1775_v55 = vpop.eup %1774  ;;  %1208 = vst [vmem:[%s2393_s17 + $0x178] sm:$0xff] %v1080_v54  ;;  %v1082_v44 = vmul.f32 %v1773_v20, %v2573_v5  ;;  %1794 = vpow2.f32 %v1445_v46  ;;  %v1453_v54 = vmul.f32 -1.442695, %v2691_v30 }
  0xac   : > { %v1777_v59 = vpop.eup %1776  ;;  %1209 = vst [vmem:[%s2393_s17 + $0x180] sm:$0xff] %v1081_v17  ;;  %v1083_v18 = vmul.f32 %v1775_v55, %v2579_v1  ;;  %1796 = vpow2.f32 %v1446_v40  ;;  %v1454_v17 = vmul.f32 -1.442695, %v2695_v37 }
  0xad   : > { %v1779_v50 = vpop.eup %1778  ;;  %1210 = vst [vmem:[%s2393_s17 + $0x188] sm:$0xff] %v1082_v44  ;;  %v1084_v62 = vmul.f32 %v1777_v59, %v2585_v31  ;;  %1798 = vpow2.f32 %v1447_v51  ;;  %v2705_v51 = vld [vmem:[%s2306_s30 + $0x238] sm:$0xff]  ;;  %v1455_v44 = vmul.f32 -1.442695, %v2700_v63 }
  0xae   : > { %v1781_v52 = vpop.eup %1780  ;;  %1211 = vst [vmem:[%s2393_s17 + $0x190] sm:$0xff] %v1083_v18  ;;  %v701_v9 = vadd.f32 1.0, %v1779_v50  ;;  %1800 = vpow2.f32 %v1448_v11  ;;  %v2711_v11 = vld [vmem:[%s2306_s30 + $0x240] sm:$0xff]  ;;  %v1456_v18 = vmul.f32 -1.442695, %v2705_v51  ;;  %v2723_v50 = vld [vmem:[%s2306_s30 + $0x250] sm:$0xff] }
  0xaf   : > { %v1783_v22 = vpop.eup %1782  ;;  %1212 = vst [vmem:[%s2393_s17 + $0x198] sm:$0xff] %v1084_v62  ;;  %v702_v5 = vadd.f32 1.0, %v1781_v52  ;;  %1802 = vpow2.f32 %v1449_v21  ;;  %v2717_v21 = vld [vmem:[%s2306_s30 + $0x248] sm:$0xff]  ;;  %v1457_v52 = vmul.f32 -1.442695, %v2711_v11 }
  0xb0   : > { %v1785_v56 = vpop.eup %1784  ;;  %1804 = vrcp.f32 %v701_v9  ;;  %v703_v57 = vadd.f32 1.0, %v1783_v22  ;;  %v2729_v9 = vld [vmem:[%s2306_s30 + $0x258] sm:$0xff] }
  0xb1   : > { %v1787_v58 = vpop.eup %1786  ;;  %1806 = vrcp.f32 %v702_v5  ;;  %v704_v1 = vadd.f32 1.0, %v1785_v56  ;;  %v1458_v5 = vmul.f32 -1.442695, %v2717_v21  ;;  %v2735_v56 = vld [vmem:[%s2306_s30 + $0x260] sm:$0xff] }
  0xb2   : > { %v1789_v60 = vpop.eup %1788  ;;  %1808 = vrcp.f32 %v703_v57  ;;  %v705_v16 = vadd.f32 1.0, %v1787_v58  ;;  %v1459_v58 = vmul.f32 -1.442695, %v2723_v50 }
  0xb3   : > { %v1791_v31 = vpop.eup %1790  ;;  %1810 = vrcp.f32 %v704_v1  ;;  %v706_v25 = vadd.f32 1.0, %v1789_v60  ;;  %v2741_v1 = vld [vmem:[%s2306_s30 + $0x268] sm:$0xff] }
  0xb4   : > { %v1793_v24 = vpop.eup %1792  ;;  %1812 = vrcp.f32 %v705_v16  ;;  %v707_v3 = vadd.f32 1.0, %v1791_v31  ;;  %v1460_v16 = vmul.f32 -1.442695, %v2729_v9 }
  0xb5   : > { %v1795_v29 = vpop.eup %1794  ;;  %1814 = vrcp.f32 %v706_v25  ;;  %v708_v28 = vadd.f32 1.0, %v1793_v24 }
  0xb6   : > { %v1797_v15 = vpop.eup %1796  ;;  %1816 = vrcp.f32 %v707_v3  ;;  %v709_v19 = vadd.f32 1.0, %v1795_v29 }
  0xb7   : > { %v1799_v36 = vpop.eup %1798  ;;  %1818 = vrcp.f32 %v708_v28  ;;  %v710_v34 = vadd.f32 1.0, %v1797_v15 }
  0xb8   : > { %v1801_v26 = vpop.eup %1800  ;;  %1820 = vrcp.f32 %v709_v19  ;;  %v711_v6 = vadd.f32 1.0, %v1799_v36 }
  0xb9   : > { %v1803_v27 = vpop.eup %1802  ;;  %1822 = vrcp.f32 %v710_v34  ;;  %v712_v7 = vadd.f32 1.0, %v1801_v26 }
  0xba   : > { %v1805_v43 = vpop.eup %1804  ;;  %1824 = vrcp.f32 %v711_v6  ;;  %v713_v42 = vadd.f32 1.0, %v1803_v27 }
  0xbb   : > { %v1807_v47 = vpop.eup %1806  ;;  %v1085_v46 = vmul.f32 %v1805_v43, %v2603_v53  ;;  %1826 = vrcp.f32 %v712_v7 }
  0xbc   : > { %v1809_v40 = vpop.eup %1808  ;;  %v1086_v41 = vmul.f32 %v1807_v47, %v2606_v4  ;;  %1828 = vrcp.f32 %v713_v42 }
  0xbd   : > { %v1811_v20 = vpop.eup %1810  ;;  %1213 = vst [vmem:[%s2393_s17 + $0x1a0] sm:$0xff] %v1085_v46  ;;  %v1087_v53 = vmul.f32 %v1809_v40, %v2609_v0  ;;  %1830 = vpow2.f32 %v1450_v48 }
  0xbe   : > { %v1813_v55 = vpop.eup %1812  ;;  %1214 = vst [vmem:[%s2393_s17 + $0x1a8] sm:$0xff] %v1086_v41  ;;  %v1088_v4 = vmul.f32 %v1811_v20, %v2613_v61  ;;  %1832 = vpow2.f32 %v1451_v33  ;;  %v2759_v41 = vld [vmem:[%s2306_s30 + $0x270] sm:$0xff] }
  0xbf   : > { %v1815_v59 = vpop.eup %1814  ;;  %1215 = vst [vmem:[%s2393_s17 + $0x1b0] sm:$0xff] %v1087_v53  ;;  %v1089_v0 = vmul.f32 %v1813_v55, %v2617_v10  ;;  %1834 = vpow2.f32 %v1452_v39  ;;  %v2762_v53 = vld [vmem:[%s2306_s30 + $0x278] sm:$0xff] }
  0xc0   : > { %v1817_v62 = vpop.eup %1816  ;;  %1216 = vst [vmem:[%s2393_s17 + $0x1b8] sm:$0xff] %v1088_v4  ;;  %v1090_v61 = vmul.f32 %v1815_v59, %v2622_v8  ;;  %1836 = vpow2.f32 %v1453_v54  ;;  %v2765_v4 = vld [vmem:[%s2306_s30 + $0x280] sm:$0xff] }
  0xc1   : > { %v1819_v22 = vpop.eup %1818  ;;  %1217 = vst [vmem:[%s2393_s17 + $0x1c0] sm:$0xff] %v1089_v0  ;;  %v1091_v10 = vmul.f32 %v1817_v62, %v2627_v2  ;;  %1838 = vpow2.f32 %v1454_v17  ;;  %v1463_v0 = vmul.f32 -1.442695, %v2759_v41 }
  0xc2   : > { %v1821_v57 = vpop.eup %1820  ;;  %1218 = vst [vmem:[%s2393_s17 + $0x1c8] sm:$0xff] %v1090_v61  ;;  %v1092_v8 = vmul.f32 %v1819_v22, %v2633_v13  ;;  %1840 = vpow2.f32 %v1455_v44  ;;  %v1461_v13 = vmul.f32 -1.442695, %v2735_v56  ;;  %v2773_v22 = vld [vmem:[%s2306_s30 + $0x290] sm:$0xff] }
  0xc3   : > { %v1823_v60 = vpop.eup %1822  ;;  %1219 = vst [vmem:[%s2393_s17 + $0x1d0] sm:$0xff] %v1091_v10  ;;  %v1093_v2 = vmul.f32 %v1821_v57, %v2639_v14  ;;  %1842 = vpow2.f32 %v1456_v18  ;;  %v1462_v14 = vmul.f32 -1.442695, %v2741_v1  ;;  %v2769_v18 = vld [vmem:[%s2306_s30 + $0x288] sm:$0xff]  ;;  %v1465_v57 = vmul.f32 -1.442695, %v2765_v4 }
  0xc4   : > { %v1825_v31 = vpop.eup %1824  ;;  %1220 = vst [vmem:[%s2393_s17 + $0x1d8] sm:$0xff] %v1092_v8  ;;  %v1094_v25 = vmul.f32 %v1823_v60, %v2645_v32  ;;  %1844 = vpow2.f32 %v1457_v52  ;;  %v1464_v52 = vmul.f32 -1.442695, %v2762_v53  ;;  %v2778_v8 = vld [vmem:[%s2306_s30 + $0x298] sm:$0xff] }
  0xc5   : > { %v1827_v24 = vpop.eup %1826  ;;  %1221 = vst [vmem:[%s2393_s17 + $0x1e0] sm:$0xff] %v1093_v2  ;;  %v1095_v3 = vmul.f32 %v1825_v31, %v2651_v12  ;;  %1846 = vpow2.f32 %v1458_v5  ;;  %v1466_v2 = vmul.f32 -1.442695, %v2769_v18 }
  0xc6   : > { %v1829_v29 = vpop.eup %1828  ;;  %1222 = vst [vmem:[%s2393_s17 + $0x1e8] sm:$0xff] %v1094_v25  ;;  %v1096_v28 = vmul.f32 %v1827_v24, %v2657_v38  ;;  %1848 = vpow2.f32 %v1459_v58  ;;  %v1467_v25 = vmul.f32 -1.442695, %v2773_v22 }
  0xc7   : > { %v1831_v15 = vpop.eup %1830  ;;  %1223 = vst [vmem:[%s2393_s17 + $0x1f0] sm:$0xff] %v1095_v3  ;;  %v1097_v32 = vmul.f32 %v1829_v29, %v2663_v49  ;;  %1850 = vpow2.f32 %v1460_v16  ;;  %v2783_v16 = vld [vmem:[%s2306_s30 + $0x2a0] sm:$0xff]  ;;  %v1468_v3 = vmul.f32 -1.442695, %v2778_v8 }
  0xc8   : > { %v1833_v19 = vpop.eup %1832  ;;  %1224 = vst [vmem:[%s2393_s17 + $0x1f8] sm:$0xff] %v1096_v28  ;;  %v714_v36 = vadd.f32 1.0, %v1831_v15  ;;  %1852 = vpow2.f32 %v1461_v13  ;;  %v2789_v13 = vld [vmem:[%s2306_s30 + $0x2a8] sm:$0xff]  ;;  %v1469_v28 = vmul.f32 -1.442695, %v2783_v16  ;;  %v2801_v15 = vld [vmem:[%s2306_s30 + $0x2b8] sm:$0xff] }
  0xc9   : > { %v1835_v34 = vpop.eup %1834  ;;  %1225 = vst [vmem:[%s2393_s17 + $0x200] sm:$0xff] %v1097_v32  ;;  %v715_v12 = vadd.f32 1.0, %v1833_v19  ;;  %1854 = vpow2.f32 %v1462_v14  ;;  %v2795_v14 = vld [vmem:[%s2306_s30 + $0x2b0] sm:$0xff]  ;;  %v1470_v19 = vmul.f32 -1.442695, %v2789_v13 }
  0xca   : > { %v1837_v26 = vpop.eup %1836  ;;  %1856 = vrcp.f32 %v714_v36  ;;  %v716_v6 = vadd.f32 1.0, %v1835_v34  ;;  %v2807_v36 = vld [vmem:[%s2306_s30 + $0x2c0] sm:$0xff] }
  0xcb   : > { %v1839_v27 = vpop.eup %1838  ;;  %1858 = vrcp.f32 %v715_v12  ;;  %v717_v38 = vadd.f32 1.0, %v1837_v26  ;;  %v1471_v12 = vmul.f32 -1.442695, %v2795_v14  ;;  %v2813_v26 = vld [vmem:[%s2306_s30 + $0x2c8] sm:$0xff] }
  0xcc   : > { %v1841_v7 = vpop.eup %1840  ;;  %1860 = vrcp.f32 %v716_v6  ;;  %v718_v48 = vadd.f32 1.0, %v1839_v27  ;;  %v1472_v27 = vmul.f32 -1.442695, %v2801_v15 }
  0xcd   : > { %v1843_v49 = vpop.eup %1842  ;;  %1862 = vrcp.f32 %v717_v38  ;;  %v719_v43 = vadd.f32 1.0, %v1841_v7  ;;  %v2819_v38 = vld [vmem:[%s2306_s30 + $0x2d0] sm:$0xff] }
  0xce   : > { %v1845_v42 = vpop.eup %1844  ;;  %1864 = vrcp.f32 %v718_v48  ;;  %v720_v33 = vadd.f32 1.0, %v1843_v49  ;;  %v1473_v48 = vmul.f32 -1.442695, %v2807_v36 }
  0xcf   : > { %v1847_v47 = vpop.eup %1846  ;;  %1866 = vrcp.f32 %v719_v43  ;;  %v721_v46 = vadd.f32 1.0, %v1845_v42 }
  0xd0   : > { %v1849_v39 = vpop.eup %1848  ;;  %1868 = vrcp.f32 %v720_v33  ;;  %v722_v40 = vadd.f32 1.0, %v1847_v47 }
  0xd1   : > { %v1851_v54 = vpop.eup %1850  ;;  %1870 = vrcp.f32 %v721_v46  ;;  %v723_v20 = vadd.f32 1.0, %v1849_v39 }
  0xd2   : > { %v1853_v17 = vpop.eup %1852  ;;  %1872 = vrcp.f32 %v722_v40  ;;  %v724_v55 = vadd.f32 1.0, %v1851_v54 }
  0xd3   : > { %v1855_v44 = vpop.eup %1854  ;;  %1874 = vrcp.f32 %v723_v20  ;;  %v725_v59 = vadd.f32 1.0, %v1853_v17 }
  0xd4   : > { %v1857_v62 = vpop.eup %1856  ;;  %1876 = vrcp.f32 %v724_v55  ;;  %v726_v61 = vadd.f32 1.0, %v1855_v44 }
  0xd5   : > { %v1859_v10 = vpop.eup %1858  ;;  %v1098_v5 = vmul.f32 %v1857_v62, %v2681_v23  ;;  %1878 = vrcp.f32 %v725_v59 }
  0xd6   : > { %v1861_v58 = vpop.eup %1860  ;;  %v1099_v60 = vmul.f32 %v1859_v10, %v2684_v35  ;;  %1880 = vrcp.f32 %v726_v61 }
  0xd7   : > { %v1863_v31 = vpop.eup %1862  ;;  %1226 = vst [vmem:[%s2393_s17 + $0x208] sm:$0xff] %v1098_v5  ;;  %v1100_v23 = vmul.f32 %v1861_v58, %v2687_v45  ;;  %1882 = vpow2.f32 %v1463_v0 }
  0xd8   : > { %v1865_v24 = vpop.eup %1864  ;;  %1227 = vst [vmem:[%s2393_s17 + $0x210] sm:$0xff] %v1099_v60  ;;  %v1101_v35 = vmul.f32 %v1863_v31, %v2691_v30  ;;  %1884 = vpow2.f32 %v1464_v52  ;;  %v2837_v60 = vld [vmem:[%s2306_s30 + $0x2d8] sm:$0xff] }
  0xd9   : > { %v1867_v29 = vpop.eup %1866  ;;  %1228 = vst [vmem:[%s2393_s17 + $0x218] sm:$0xff] %v1100_v23  ;;  %v1102_v45 = vmul.f32 %v1865_v24, %v2695_v37  ;;  %1886 = vpow2.f32 %v1465_v57  ;;  %v2840_v23 = vld [vmem:[%s2306_s30 + $0x2e0] sm:$0xff] }
  0xda   : > { %v1869_v32 = vpop.eup %1868  ;;  %1229 = vst [vmem:[%s2393_s17 + $0x220] sm:$0xff] %v1101_v35  ;;  %v1103_v30 = vmul.f32 %v1867_v29, %v2700_v63  ;;  %1888 = vpow2.f32 %v1466_v2  ;;  %v2843_v35 = vld [vmem:[%s2306_s30 + $0x2e8] sm:$0xff] }
  0xdb   : > { %v1871_v34 = vpop.eup %1870  ;;  %1230 = vst [vmem:[%s2393_s17 + $0x228] sm:$0xff] %v1102_v45  ;;  %v1104_v37 = vmul.f32 %v1869_v32, %v2705_v51  ;;  %1890 = vpow2.f32 %v1467_v25  ;;  %v1476_v45 = vmul.f32 -1.442695, %v2837_v60 }
  0xdc   : > { %v1873_v6 = vpop.eup %1872  ;;  %1231 = vst [vmem:[%s2393_s17 + $0x230] sm:$0xff] %v1103_v30  ;;  %v1105_v63 = vmul.f32 %v1871_v34, %v2711_v11  ;;  %1892 = vpow2.f32 %v1468_v3  ;;  %v1474_v11 = vmul.f32 -1.442695, %v2813_v26  ;;  %v2851_v34 = vld [vmem:[%s2306_s30 + $0x2f8] sm:$0xff] }
  0xdd   : > { %v1875_v7 = vpop.eup %1874  ;;  %1232 = vst [vmem:[%s2393_s17 + $0x238] sm:$0xff] %v1104_v37  ;;  %v1106_v51 = vmul.f32 %v1873_v6, %v2717_v21  ;;  %1894 = vpow2.f32 %v1469_v28  ;;  %v1475_v21 = vmul.f32 -1.442695, %v2819_v38  ;;  %v2847_v28 = vld [vmem:[%s2306_s30 + $0x2f0] sm:$0xff]  ;;  %v1478_v6 = vmul.f32 -1.442695, %v2843_v35 }
  0xde   : > { %v1877_v49 = vpop.eup %1876  ;;  %1233 = vst [vmem:[%s2393_s17 + $0x240] sm:$0xff] %v1105_v63  ;;  %v1107_v43 = vmul.f32 %v1875_v7, %v2723_v50  ;;  %1896 = vpow2.f32 %v1470_v19  ;;  %v1477_v19 = vmul.f32 -1.442695, %v2840_v23  ;;  %v2856_v63 = vld [vmem:[%s2306_s30 + $0x300] sm:$0xff] }
  0xdf   : > { %v1879_v42 = vpop.eup %1878  ;;  %1234 = vst [vmem:[%s2393_s17 + $0x248] sm:$0xff] %v1106_v51  ;;  %v1108_v33 = vmul.f32 %v1877_v49, %v2729_v9  ;;  %1898 = vpow2.f32 %v1471_v12  ;;  %v1479_v51 = vmul.f32 -1.442695, %v2847_v28 }
  0xe0   : > { %v1881_v47 = vpop.eup %1880  ;;  %1235 = vst [vmem:[%s2393_s17 + $0x250] sm:$0xff] %v1107_v43  ;;  %v1109_v46 = vmul.f32 %v1879_v42, %v2735_v56  ;;  %1900 = vpow2.f32 %v1472_v27  ;;  %v1480_v43 = vmul.f32 -1.442695, %v2851_v34 }
  0xe1   : > { %v1883_v39 = vpop.eup %1882  ;;  %1236 = vst [vmem:[%s2393_s17 + $0x258] sm:$0xff] %v1108_v33  ;;  %v1110_v50 = vmul.f32 %v1881_v47, %v2741_v1  ;;  %1902 = vpow2.f32 %v1473_v48  ;;  %v2861_v48 = vld [vmem:[%s2306_s30 + $0x308] sm:$0xff]  ;;  %v1481_v33 = vmul.f32 -1.442695, %v2856_v63 }
  0xe2   : > { %v1885_v40 = vpop.eup %1884  ;;  %1237 = vst [vmem:[%s2393_s17 + $0x260] sm:$0xff] %v1109_v46  ;;  %v727_v54 = vadd.f32 1.0, %v1883_v39  ;;  %1904 = vpow2.f32 %v1474_v11  ;;  %v2867_v11 = vld [vmem:[%s2306_s30 + $0x310] sm:$0xff]  ;;  %v1482_v46 = vmul.f32 -1.442695, %v2861_v48  ;;  %v2879_v39 = vld [vmem:[%s2306_s30 + $0x320] sm:$0xff] }
  0xe3   : > { %v1887_v20 = vpop.eup %1886  ;;  %1238 = vst [vmem:[%s2393_s17 + $0x268] sm:$0xff] %v1110_v50  ;;  %v728_v9 = vadd.f32 1.0, %v1885_v40  ;;  %1906 = vpow2.f32 %v1475_v21  ;;  %v2873_v21 = vld [vmem:[%s2306_s30 + $0x318] sm:$0xff]  ;;  %v1483_v40 = vmul.f32 -1.442695, %v2867_v11 }
  0xe4   : > { %v1889_v17 = vpop.eup %1888  ;;  %1908 = vrcp.f32 %v727_v54  ;;  %v729_v55 = vadd.f32 1.0, %v1887_v20  ;;  %v2885_v54 = vld [vmem:[%s2306_s30 + $0x328] sm:$0xff] }
  0xe5   : > { %v1891_v44 = vpop.eup %1890  ;;  %1910 = vrcp.f32 %v728_v9  ;;  %v730_v56 = vadd.f32 1.0, %v1889_v17  ;;  %v1484_v9 = vmul.f32 -1.442695, %v2873_v21  ;;  %v2891_v17 = vld [vmem:[%s2306_s30 + $0x330] sm:$0xff] }
  0xe6   : > { %v1893_v59 = vpop.eup %1892  ;;  %1912 = vrcp.f32 %v729_v55  ;;  %v731_v0 = vadd.f32 1.0, %v1891_v44  ;;  %v1485_v44 = vmul.f32 -1.442695, %v2879_v39 }
  0xe7   : > { %v1895_v1 = vpop.eup %1894  ;;  %1914 = vrcp.f32 %v730_v56  ;;  %v732_v62 = vadd.f32 1.0, %v1893_v59  ;;  %v2897_v56 = vld [vmem:[%s2306_s30 + $0x338] sm:$0xff] }
  0xe8   : > { %v1897_v61 = vpop.eup %1896  ;;  %1916 = vrcp.f32 %v731_v0  ;;  %v733_v52 = vadd.f32 1.0, %v1895_v1  ;;  %v1486_v0 = vmul.f32 -1.442695, %v2885_v54 }
  0xe9   : > { %v1899_v10 = vpop.eup %1898  ;;  %1918 = vrcp.f32 %v732_v62  ;;  %v734_v5 = vadd.f32 1.0, %v1897_v61 }
  0xea   : > { %v1901_v57 = vpop.eup %1900  ;;  %1920 = vrcp.f32 %v733_v52  ;;  %v735_v58 = vadd.f32 1.0, %v1899_v10 }
  0xeb   : > { %v1903_v2 = vpop.eup %1902  ;;  %1922 = vrcp.f32 %v734_v5  ;;  %v736_v31 = vadd.f32 1.0, %v1901_v57 }
  0xec   : > { %v1905_v25 = vpop.eup %1904  ;;  %1924 = vrcp.f32 %v735_v58  ;;  %v737_v24 = vadd.f32 1.0, %v1903_v2 }
  0xed   : > { %v1907_v3 = vpop.eup %1906  ;;  %1926 = vrcp.f32 %v736_v31  ;;  %v738_v29 = vadd.f32 1.0, %v1905_v25 }
  0xee   : > { %v1909_v32 = vpop.eup %1908  ;;  %1928 = vrcp.f32 %v737_v24  ;;  %v739_v30 = vadd.f32 1.0, %v1907_v3 }
  0xef   : > { %v1911_v37 = vpop.eup %1910  ;;  %v1111_v12 = vmul.f32 %v1909_v32, %v2759_v41  ;;  %1930 = vrcp.f32 %v738_v29 }
  0xf0   : > { %v1913_v27 = vpop.eup %1912  ;;  %v1112_v7 = vmul.f32 %v1911_v37, %v2762_v53  ;;  %1932 = vrcp.f32 %v739_v30 }
  0xf1   : > { %v1915_v49 = vpop.eup %1914  ;;  %1239 = vst [vmem:[%s2393_s17 + $0x270] sm:$0xff] %v1111_v12  ;;  %v1113_v41 = vmul.f32 %v1913_v27, %v2765_v4  ;;  %1934 = vpow2.f32 %v1476_v45 }
  0xf2   : > { %v1917_v42 = vpop.eup %1916  ;;  %1240 = vst [vmem:[%s2393_s17 + $0x278] sm:$0xff] %v1112_v7  ;;  %v1114_v53 = vmul.f32 %v1915_v49, %v2769_v18  ;;  %1936 = vpow2.f32 %v1477_v19  ;;  %v2915_v7 = vld [vmem:[%s2306_s30 + $0x340] sm:$0xff] }
  0xf3   : > { %v1919_v47 = vpop.eup %1918  ;;  %1241 = vst [vmem:[%s2393_s17 + $0x280] sm:$0xff] %v1113_v41  ;;  %v1115_v4 = vmul.f32 %v1917_v42, %v2773_v22  ;;  %1938 = vpow2.f32 %v1478_v6  ;;  %v2918_v41 = vld [vmem:[%s2306_s30 + $0x348] sm:$0xff] }
  0xf4   : > { %v1921_v50 = vpop.eup %1920  ;;  %1242 = vst [vmem:[%s2393_s17 + $0x288] sm:$0xff] %v1114_v53  ;;  %v1116_v18 = vmul.f32 %v1919_v47, %v2778_v8  ;;  %1940 = vpow2.f32 %v1479_v51  ;;  %v2921_v53 = vld [vmem:[%s2306_s30 + $0x350] sm:$0xff] }
  0xf5   : > { %v1923_v20 = vpop.eup %1922  ;;  %1243 = vst [vmem:[%s2393_s17 + $0x290] sm:$0xff] %v1115_v4  ;;  %v1117_v22 = vmul.f32 %v1921_v50, %v2783_v16  ;;  %1942 = vpow2.f32 %v1480_v43  ;;  %v1489_v4 = vmul.f32 -1.442695, %v2915_v7 }
  0xf6   : > { %v1925_v55 = vpop.eup %1924  ;;  %1244 = vst [vmem:[%s2393_s17 + $0x298] sm:$0xff] %v1116_v18  ;;  %v1118_v8 = vmul.f32 %v1923_v20, %v2789_v13  ;;  %1944 = vpow2.f32 %v1481_v33  ;;  %v1487_v13 = vmul.f32 -1.442695, %v2891_v17  ;;  %v2929_v20 = vld [vmem:[%s2306_s30 + $0x360] sm:$0xff] }
  0xf7   : > { %v1927_v59 = vpop.eup %1926  ;;  %1245 = vst [vmem:[%s2393_s17 + $0x2a0] sm:$0xff] %v1117_v22  ;;  %v1119_v16 = vmul.f32 %v1925_v55, %v2795_v14  ;;  %1946 = vpow2.f32 %v1482_v46  ;;  %v1488_v14 = vmul.f32 -1.442695, %v2897_v56  ;;  %v2925_v46 = vld [vmem:[%s2306_s30 + $0x358] sm:$0xff]  ;;  %v1491_v55 = vmul.f32 -1.442695, %v2921_v53 }
  0xf8   : > { %v1929_v1 = vpop.eup %1928  ;;  %1246 = vst [vmem:[%s2393_s17 + $0x2a8] sm:$0xff] %v1118_v8  ;;  %v1120_v62 = vmul.f32 %v1927_v59, %v2801_v15  ;;  %1948 = vpow2.f32 %v1483_v40  ;;  %v1490_v40 = vmul.f32 -1.442695, %v2918_v41  ;;  %v2934_v8 = vld [vmem:[%s2306_s30 + $0x368] sm:$0xff] }
  0xf9   : > { %v1931_v61 = vpop.eup %1930  ;;  %1247 = vst [vmem:[%s2393_s17 + $0x2b0] sm:$0xff] %v1119_v16  ;;  %v1121_v52 = vmul.f32 %v1929_v1, %v2807_v36  ;;  %1950 = vpow2.f32 %v1484_v9  ;;  %v1492_v16 = vmul.f32 -1.442695, %v2925_v46 }
  0xfa   : > { %v1933_v10 = vpop.eup %1932  ;;  %1248 = vst [vmem:[%s2393_s17 + $0x2b8] sm:$0xff] %v1120_v62  ;;  %v1122_v5 = vmul.f32 %v1931_v61, %v2813_v26  ;;  %1952 = vpow2.f32 %v1485_v44  ;;  %v1493_v62 = vmul.f32 -1.442695, %v2929_v20 }
  0xfb   : > { %v1935_v57 = vpop.eup %1934  ;;  %1249 = vst [vmem:[%s2393_s17 + $0x2c0] sm:$0xff] %v1121_v52  ;;  %v1123_v15 = vmul.f32 %v1933_v10, %v2819_v38  ;;  %1954 = vpow2.f32 %v1486_v0  ;;  %v2939_v0 = vld [vmem:[%s2306_s30 + $0x370] sm:$0xff]  ;;  %v1494_v52 = vmul.f32 -1.442695, %v2934_v8 }
  0xfc   : > { %v1937_v58 = vpop.eup %1936  ;;  %1250 = vst [vmem:[%s2393_s17 + $0x2c8] sm:$0xff] %v1122_v5  ;;  %v740_v2 = vadd.f32 1.0, %v1935_v57  ;;  %1956 = vpow2.f32 %v1487_v13  ;;  %v2945_v13 = vld [vmem:[%s2306_s30 + $0x378] sm:$0xff]  ;;  %v1495_v5 = vmul.f32 -1.442695, %v2939_v0  ;;  %v2957_v57 = vld [vmem:[%s2306_s30 + $0x388] sm:$0xff] }
  0xfd   : > { %v1939_v31 = vpop.eup %1938  ;;  %1251 = vst [vmem:[%s2393_s17 + $0x2d0] sm:$0xff] %v1123_v15  ;;  %v741_v36 = vadd.f32 1.0, %v1937_v58  ;;  %1958 = vpow2.f32 %v1488_v14  ;;  %v2951_v14 = vld [vmem:[%s2306_s30 + $0x380] sm:$0xff]  ;;  %v1496_v58 = vmul.f32 -1.442695, %v2945_v13 }
  0xfe   : > { %v1941_v25 = vpop.eup %1940  ;;  %1960 = vrcp.f32 %v740_v2  ;;  %v742_v24 = vadd.f32 1.0, %v1939_v31  ;;  %v2963_v2 = vld [vmem:[%s2306_s30 + $0x390] sm:$0xff] }
  0xff   : > { %v1943_v3 = vpop.eup %1942  ;;  %1962 = vrcp.f32 %v741_v36  ;;  %v743_v26 = vadd.f32 1.0, %v1941_v25  ;;  %v1497_v36 = vmul.f32 -1.442695, %v2951_v14  ;;  %v2969_v25 = vld [vmem:[%s2306_s30 + $0x398] sm:$0xff] }
 0x100   : > { %v1945_v29 = vpop.eup %1944  ;;  %1964 = vrcp.f32 %v742_v24  ;;  %v744_v45 = vadd.f32 1.0, %v1943_v3  ;;  %v1498_v3 = vmul.f32 -1.442695, %v2957_v57 }
 0x101   : > { %v1947_v38 = vpop.eup %1946  ;;  %1966 = vrcp.f32 %v743_v26  ;;  %v745_v32 = vadd.f32 1.0, %v1945_v29  ;;  %v2975_v26 = vld [vmem:[%s2306_s30 + $0x3a0] sm:$0xff] }
 0x102   : > { %v1949_v30 = vpop.eup %1948  ;;  %1968 = vrcp.f32 %v744_v45  ;;  %v746_v19 = vadd.f32 1.0, %v1947_v38  ;;  %v1499_v45 = vmul.f32 -1.442695, %v2963_v2 }
 0x103   : > { %v1951_v37 = vpop.eup %1950  ;;  %1970 = vrcp.f32 %v745_v32  ;;  %v747_v12 = vadd.f32 1.0, %v1949_v30 }
 0x104   : > { %v1953_v6 = vpop.eup %1952  ;;  %1972 = vrcp.f32 %v746_v19  ;;  %v748_v27 = vadd.f32 1.0, %v1951_v37 }
 0x105   : > { %v1955_v51 = vpop.eup %1954  ;;  %1974 = vrcp.f32 %v747_v12  ;;  %v749_v49 = vadd.f32 1.0, %v1953_v6 }
 0x106   : > { %v1957_v43 = vpop.eup %1956  ;;  %1976 = vrcp.f32 %v748_v27  ;;  %v750_v42 = vadd.f32 1.0, %v1955_v51 }
 0x107   : > { %v1959_v33 = vpop.eup %1958  ;;  %1978 = vrcp.f32 %v749_v49  ;;  %v751_v47 = vadd.f32 1.0, %v1957_v43 }
 0x108   : > { %v1961_v50 = vpop.eup %1960  ;;  %1980 = vrcp.f32 %v750_v42  ;;  %v752_v18 = vadd.f32 1.0, %v1959_v33 }
 0x109   : > { %v1963_v22 = vpop.eup %1962  ;;  %v1124_v9 = vmul.f32 %v1961_v50, %v2837_v60  ;;  %1982 = vrcp.f32 %v751_v47 }
 0x10a   : > { %v1965_v44 = vpop.eup %1964  ;;  %v1125_v59 = vmul.f32 %v1963_v22, %v2840_v23  ;;  %1984 = vrcp.f32 %v752_v18 }
 0x10b   : > { %v1967_v1 = vpop.eup %1966  ;;  %1252 = vst [vmem:[%s2393_s17 + $0x2d8] sm:$0xff] %v1124_v9  ;;  %v1126_v60 = vmul.f32 %v1965_v44, %v2843_v35  ;;  %1986 = vpow2.f32 %v1489_v4 }
 0x10c   : > { %v1969_v61 = vpop.eup %1968  ;;  %1253 = vst [vmem:[%s2393_s17 + $0x2e0] sm:$0xff] %v1125_v59  ;;  %v1127_v23 = vmul.f32 %v1967_v1, %v2847_v28  ;;  %1988 = vpow2.f32 %v1490_v40  ;;  %v2993_v59 = vld [vmem:[%s2306_s30 + $0x3a8] sm:$0xff] }
 0x10d   : > { %v1971_v10 = vpop.eup %1970  ;;  %1254 = vst [vmem:[%s2393_s17 + $0x2e8] sm:$0xff] %v1126_v60  ;;  %v1128_v35 = vmul.f32 %v1969_v61, %v2851_v34  ;;  %1990 = vpow2.f32 %v1491_v55  ;;  %v2996_v60 = vld [vmem:[%s2306_s30 + $0x3b0] sm:$0xff] }
 0x10e   : > { %v1973_v15 = vpop.eup %1972  ;;  %1255 = vst [vmem:[%s2393_s17 + $0x2f0] sm:$0xff] %v1127_v23  ;;  %v1129_v28 = vmul.f32 %v1971_v10, %v2856_v63  ;;  %1992 = vpow2.f32 %v1492_v16  ;;  %v2999_v23 = vld [vmem:[%s2306_s30 + $0x3b8] sm:$0xff] }
 0x10f   : > { %v1975_v31 = vpop.eup %1974  ;;  %1256 = vst [vmem:[%s2393_s17 + $0x2f8] sm:$0xff] %v1128_v35  ;;  %v1130_v34 = vmul.f32 %v1973_v15, %v2861_v48  ;;  %1994 = vpow2.f32 %v1493_v62  ;;  %v1502_v35 = vmul.f32 -1.442695, %v2993_v59 }
 0x110   : > { %v1977_v24 = vpop.eup %1976  ;;  %1257 = vst [vmem:[%s2393_s17 + $0x300] sm:$0xff] %v1129_v28  ;;  %v1131_v63 = vmul.f32 %v1975_v31, %v2867_v11  ;;  %1996 = vpow2.f32 %v1494_v52  ;;  %v1500_v11 = vmul.f32 -1.442695, %v2969_v25  ;;  %v3007_v31 = vld [vmem:[%s2306_s30 + $0x3c8] sm:$0xff] }
 0x111   : > { %v1979_v29 = vpop.eup %1978  ;;  %1258 = vst [vmem:[%s2393_s17 + $0x308] sm:$0xff] %v1130_v34  ;;  %v1132_v48 = vmul.f32 %v1977_v24, %v2873_v21  ;;  %1998 = vpow2.f32 %v1495_v5  ;;  %v1501_v21 = vmul.f32 -1.442695, %v2975_v26  ;;  %v3003_v5 = vld [vmem:[%s2306_s30 + $0x3c0] sm:$0xff]  ;;  %v1504_v24 = vmul.f32 -1.442695, %v2999_v23 }
 0x112   : > { %v1981_v38 = vpop.eup %1980  ;;  %1259 = vst [vmem:[%s2393_s17 + $0x310] sm:$0xff] %v1131_v63  ;;  %v1133_v32 = vmul.f32 %v1979_v29, %v2879_v39  ;;  %2000 = vpow2.f32 %v1496_v58  ;;  %v1503_v58 = vmul.f32 -1.442695, %v2996_v60  ;;  %v3012_v63 = vld [vmem:[%s2306_s30 + $0x3d0] sm:$0xff] }
 0x113   : > { %v1983_v30 = vpop.eup %1982  ;;  %1260 = vst [vmem:[%s2393_s17 + $0x318] sm:$0xff] %v1132_v48  ;;  %v1134_v19 = vmul.f32 %v1981_v38, %v2885_v54  ;;  %2002 = vpow2.f32 %v1497_v36  ;;  %v1505_v48 = vmul.f32 -1.442695, %v3003_v5 }
 0x114   : > { %v1985_v37 = vpop.eup %1984  ;;  %1261 = vst [vmem:[%s2393_s17 + $0x320] sm:$0xff] %v1133_v32  ;;  %v1135_v12 = vmul.f32 %v1983_v30, %v2891_v17  ;;  %2004 = vpow2.f32 %v1498_v3  ;;  %v1506_v32 = vmul.f32 -1.442695, %v3007_v31 }
 0x115   : > { %v1987_v6 = vpop.eup %1986  ;;  %1262 = vst [vmem:[%s2393_s17 + $0x328] sm:$0xff] %v1134_v19  ;;  %v1136_v39 = vmul.f32 %v1985_v37, %v2897_v56  ;;  %2006 = vpow2.f32 %v1499_v45  ;;  %v3017_v45 = vld [vmem:[%s2306_s30 + $0x3d8] sm:$0xff]  ;;  %v1507_v19 = vmul.f32 -1.442695, %v3012_v63 }
 0x116   : > { %v1989_v27 = vpop.eup %1988  ;;  %1263 = vst [vmem:[%s2393_s17 + $0x330] sm:$0xff] %v1135_v12  ;;  %v753_v51 = vadd.f32 1.0, %v1987_v6  ;;  %2008 = vpow2.f32 %v1500_v11  ;;  %v3023_v11 = vld [vmem:[%s2306_s30 + $0x3e0] sm:$0xff]  ;;  %v1508_v12 = vmul.f32 -1.442695, %v3017_v45  ;;  %v3035_v6 = vld [vmem:[%s2306_s30 + $0x3f0] sm:$0xff] }
 0x117   : > { %v1991_v49 = vpop.eup %1990  ;;  %1264 = vst [vmem:[%s2393_s17 + $0x338] sm:$0xff] %v1136_v39  ;;  %v754_v54 = vadd.f32 1.0, %v1989_v27  ;;  %2010 = vpow2.f32 %v1501_v21  ;;  %v3029_v21 = vld [vmem:[%s2306_s30 + $0x3e8] sm:$0xff]  ;;  %v1509_v27 = vmul.f32 -1.442695, %v3023_v11 }
 0x118   : > { %v1993_v43 = vpop.eup %1992  ;;  %2012 = vrcp.f32 %v753_v51  ;;  %v755_v42 = vadd.f32 1.0, %v1991_v49  ;;  %v3041_v51 = vld [vmem:[%s2306_s30 + $0x3f8] sm:$0xff] }
 0x119   : > { %v1995_v33 = vpop.eup %1994  ;;  %2014 = vrcp.f32 %v754_v54  ;;  %v756_v17 = vadd.f32 1.0, %v1993_v43  ;;  %v1510_v54 = vmul.f32 -1.442695, %v3029_v21 }
 0x11a   : > { %v1997_v47 = vpop.eup %1996  ;;  %2016 = vrcp.f32 %v755_v42  ;;  %v757_v4 = vadd.f32 1.0, %v1995_v33 }
 0x11b   : > { %v1999_v56 = vpop.eup %1998  ;;  %2018 = vrcp.f32 %v756_v17  ;;  %v758_v50 = vadd.f32 1.0, %v1997_v47 }
 0x11c   : > { %v2001_v18 = vpop.eup %2000  ;;  %2020 = vrcp.f32 %v757_v4  ;;  %v759_v40 = vadd.f32 1.0, %v1999_v56 }
 0x11d   : > { %v2003_v22 = vpop.eup %2002  ;;  %2022 = vrcp.f32 %v758_v50  ;;  %v760_v9 = vadd.f32 1.0, %v2001_v18 }
 0x11e   : > { %v2005_v55 = vpop.eup %2004  ;;  %2024 = vrcp.f32 %v759_v40  ;;  %v761_v44 = vadd.f32 1.0, %v2003_v22 }
 0x11f   : > { %v2007_v16 = vpop.eup %2006  ;;  %2026 = vrcp.f32 %v760_v9  ;;  %v762_v1 = vadd.f32 1.0, %v2005_v55 }
 0x120   : > { %v2009_v62 = vpop.eup %2008  ;;  %2028 = vrcp.f32 %v761_v44  ;;  %v763_v61 = vadd.f32 1.0, %v2007_v16 }
 0x121   : > { %v2011_v52 = vpop.eup %2010  ;;  %2030 = vrcp.f32 %v762_v1  ;;  %v764_v10 = vadd.f32 1.0, %v2009_v62 }
 0x122   : > { %v2013_v15 = vpop.eup %2012  ;;  %2032 = vrcp.f32 %v763_v61  ;;  %v765_v28 = vadd.f32 1.0, %v2011_v52 }
 0x123   : > { %v2015_v34 = vpop.eup %2014  ;;  %v1137_v36 = vmul.f32 %v2013_v15, %v2915_v7  ;;  %2034 = vrcp.f32 %v764_v10 }
 0x124   : > { %v2017_v3 = vpop.eup %2016  ;;  %v1138_v29 = vmul.f32 %v2015_v34, %v2918_v41  ;;  %2036 = vrcp.f32 %v765_v28 }
 0x125   : > { %v2019_v38 = vpop.eup %2018  ;;  %1265 = vst [vmem:[%s2393_s17 + $0x340] sm:$0xff] %v1137_v36  ;;  %v1139_v7 = vmul.f32 %v2017_v3, %v2921_v53  ;;  %2038 = vpow2.f32 %v1502_v35 }
 0x126   : > { %v2021_v30 = vpop.eup %2020  ;;  %1266 = vst [vmem:[%s2393_s17 + $0x348] sm:$0xff] %v1138_v29  ;;  %v1140_v41 = vmul.f32 %v2019_v38, %v2925_v46  ;;  %2040 = vpow2.f32 %v1503_v58 }
 0x127   : > { %v2023_v37 = vpop.eup %2022  ;;  %1267 = vst [vmem:[%s2393_s17 + $0x350] sm:$0xff] %v1139_v7  ;;  %v1141_v53 = vmul.f32 %v2021_v30, %v2929_v20  ;;  %2042 = vpow2.f32 %v1504_v24 }
 0x128   : > { %v2025_v39 = vpop.eup %2024  ;;  %1268 = vst [vmem:[%s2393_s17 + $0x358] sm:$0xff] %v1140_v41  ;;  %v1142_v46 = vmul.f32 %v2023_v37, %v2934_v8  ;;  %2044 = vpow2.f32 %v1505_v48  ;;  %v1511_v8 = vmul.f32 -1.442695, %v3035_v6 }
 0x129   : > { %v2027_v49 = vpop.eup %2026  ;;  %1269 = vst [vmem:[%s2393_s17 + $0x360] sm:$0xff] %v1141_v53  ;;  %v1143_v20 = vmul.f32 %v2025_v39, %v2939_v0  ;;  %2046 = vpow2.f32 %v1506_v32  ;;  %v1512_v0 = vmul.f32 -1.442695, %v3041_v51 }
 0x12a   : > { %v2029_v43 = vpop.eup %2028  ;;  %1270 = vst [vmem:[%s2393_s17 + $0x368] sm:$0xff] %v1142_v46  ;;  %v1144_v42 = vmul.f32 %v2027_v49, %v2945_v13  ;;  %2048 = vpow2.f32 %v1507_v19 }
 0x12b   : > { %v2031_v33 = vpop.eup %2030  ;;  %1271 = vst [vmem:[%s2393_s17 + $0x370] sm:$0xff] %v1143_v20  ;;  %v1145_v17 = vmul.f32 %v2029_v43, %v2951_v14  ;;  %2050 = vpow2.f32 %v1508_v12 }
 0x12c   : > { %v2033_v47 = vpop.eup %2032  ;;  %1272 = vst [vmem:[%s2393_s17 + $0x378] sm:$0xff] %v1144_v42  ;;  %v1146_v4 = vmul.f32 %v2031_v33, %v2957_v57  ;;  %2052 = vpow2.f32 %v1509_v27 }
 0x12d   : > { %v2035_v56 = vpop.eup %2034  ;;  %1273 = vst [vmem:[%s2393_s17 + $0x380] sm:$0xff] %v1145_v17  ;;  %v1147_v13 = vmul.f32 %v2033_v47, %v2963_v2  ;;  %2054 = vpow2.f32 %v1510_v54 }
 0x12e   : > { %v2037_v50 = vpop.eup %2036  ;;  %1274 = vst [vmem:[%s2393_s17 + $0x388] sm:$0xff] %v1146_v4  ;;  %v1148_v14 = vmul.f32 %v2035_v56, %v2969_v25  ;;  %2056 = vpow2.f32 %v1511_v8 }
 0x12f   : > { %v2039_v18 = vpop.eup %2038  ;;  %1275 = vst [vmem:[%s2393_s17 + $0x390] sm:$0xff] %v1147_v13  ;;  %v1149_v40 = vmul.f32 %v2037_v50, %v2975_v26  ;;  %2058 = vpow2.f32 %v1512_v0 }
 0x130   : > { %v2041_v22 = vpop.eup %2040  ;;  %1276 = vst [vmem:[%s2393_s17 + $0x398] sm:$0xff] %v1148_v14  ;;  %v766_v57 = vadd.f32 1.0, %v2039_v18 }
 0x131   : > { %v2043_v9 = vpop.eup %2042  ;;  %1277 = vst [vmem:[%s2393_s17 + $0x3a0] sm:$0xff] %v1149_v40  ;;  %v767_v55 = vadd.f32 1.0, %v2041_v22 }
 0x132   : > { %v2045_v44 = vpop.eup %2044  ;;  %2060 = vrcp.f32 %v766_v57  ;;  %v768_v2 = vadd.f32 1.0, %v2043_v9 }
 0x133   : > { %v2047_v16 = vpop.eup %2046  ;;  %2062 = vrcp.f32 %v767_v55  ;;  %v769_v1 = vadd.f32 1.0, %v2045_v44 }
 0x134   : > { %v2049_v62 = vpop.eup %2048  ;;  %2064 = vrcp.f32 %v768_v2  ;;  %v770_v25 = vadd.f32 1.0, %v2047_v16 }
 0x135   : > { %v2051_v61 = vpop.eup %2050  ;;  %2066 = vrcp.f32 %v769_v1  ;;  %v771_v52 = vadd.f32 1.0, %v2049_v62 }
 0x136   : > { %v2053_v26 = vpop.eup %2052  ;;  %2068 = vrcp.f32 %v770_v25  ;;  %v772_v10 = vadd.f32 1.0, %v2051_v61 }
 0x137   : > { %v2055_v35 = vpop.eup %2054  ;;  %2070 = vrcp.f32 %v771_v52  ;;  %v773_v15 = vadd.f32 1.0, %v2053_v26 }
 0x138   : > { %v2057_v28 = vpop.eup %2056  ;;  %2072 = vrcp.f32 %v772_v10  ;;  %v774_v58 = vadd.f32 1.0, %v2055_v35 }
 0x139   : > { %v2059_v34 = vpop.eup %2058  ;;  %2074 = vrcp.f32 %v773_v15  ;;  %v775_v36 = vadd.f32 1.0, %v2057_v28 }
 0x13a   : > { %2076 = vrcp.f32 %v774_v58  ;;  %v776_v24 = vadd.f32 1.0, %v2059_v34 }
 0x13b   : > { %2078 = vrcp.f32 %v775_v36 }
 0x13c   : > { %v2061_v3 = vpop.eup %2060  ;;  %2080 = vrcp.f32 %v776_v24 }
 0x13d   : > { %v2063_v29 = vpop.eup %2062  ;;  %v1150_v48 = vmul.f32 %v2061_v3, %v2993_v59 }
 0x13e   : > { %v2065_v38 = vpop.eup %2064  ;;  %v1151_v7 = vmul.f32 %v2063_v29, %v2996_v60 }
 0x13f   : > { %v2067_v32 = vpop.eup %2066  ;;  %1278 = vst [vmem:[%s2393_s17 + $0x3a8] sm:$0xff] %v1150_v48  ;;  %v1152_v30 = vmul.f32 %v2065_v38, %v2999_v23 }
 0x140   : > { %v2069_v41 = vpop.eup %2068  ;;  %1279 = vst [vmem:[%s2393_s17 + $0x3b0] sm:$0xff] %v1151_v7  ;;  %v1153_v19 = vmul.f32 %v2067_v32, %v3003_v5 }
 0x141   : > { %v2071_v37 = vpop.eup %2070  ;;  %1280 = vst [vmem:[%s2393_s17 + $0x3b8] sm:$0xff] %v1152_v30  ;;  %v1154_v59 = vmul.f32 %v2069_v41, %v3007_v31 }
 0x142   : > { %v2073_v53 = vpop.eup %2072  ;;  %1281 = vst [vmem:[%s2393_s17 + $0x3c0] sm:$0xff] %v1153_v19  ;;  %v1155_v60 = vmul.f32 %v2071_v37, %v3012_v63 }
 0x143   : > { %v2075_v12 = vpop.eup %2074  ;;  %1282 = vst [vmem:[%s2393_s17 + $0x3c8] sm:$0xff] %v1154_v59  ;;  %v1156_v23 = vmul.f32 %v2073_v53, %v3017_v45 }
 0x144   : > { %v2077_v5 = vpop.eup %2076  ;;  %1283 = vst [vmem:[%s2393_s17 + $0x3d0] sm:$0xff] %v1155_v60  ;;  %v1157_v39 = vmul.f32 %v2075_v12, %v3023_v11 }
 0x145   : > { %v2079_v31 = vpop.eup %2078  ;;  %1284 = vst [vmem:[%s2393_s17 + $0x3d8] sm:$0xff] %v1156_v23  ;;  %v1158_v46 = vmul.f32 %v2077_v5, %v3029_v21 }
 0x146   : > { %v2081_v63 = vpop.eup %2080  ;;  %1285 = vst [vmem:[%s2393_s17 + $0x3e0] sm:$0xff] %v1157_v39  ;;  %v1159_v27 = vmul.f32 %v2079_v31, %v3035_v6 }
 0x147   : > { %1286 = vst [vmem:[%s2393_s17 + $0x3e8] sm:$0xff] %v1158_v46  ;;  %v1160_v45 = vmul.f32 %v2081_v63, %v3041_v51 }
 0x148   : > { %1287 = vst [vmem:[%s2393_s17 + $0x3f0] sm:$0xff] %v1159_v27 }
 0x149   : > { %1288 = vst [vmem:[%s2393_s17 + $0x3f8] sm:$0xff] %v1160_v45 }
 0x14a   : > { %2125 = shalt.err (!%p2122_p2)
}
 0x14b   : > { %s2126_s13 = scalar_lea.hbm %s3085_s10, 16384  ;;  %s2130_s20 = scalar_lea.hbm %s3136_s1, 32768 }
 0x14c   : > { %p2127_p4 = scmp.ne.s32.totalorder %s3085_s10, %s2126_s13  ;;  %p2131_p9 = scmp.lt.u32.totalorder %s3085_s10, %s3136_s1 }
 0x14d   : > { %p2132_p1 = scmp.lt.u32.totalorder %s2130_s20, %s2126_s13  ;;  %p2134_p6 = scmp.lt.u32.totalorder %s2126_s13, %s3085_s10 }
 0x14e   : > { %p2128_p5 = pnand %p2127_p4, %p3143_p11 }
 0x14f   : > { %p2133_p3 = por %p2132_p1, %p2131_p9 }
 0x150   : > { %p2129_p7 = pneg %p2128_p5 }
 0x151   : > { %p2135_p12 = por %p2134_p6, %p2133_p3 }
 0x153   : > { %p2136_p13 = pnand %p2135_p12, %p2129_p7 }
 0x155   : > { %2139 = shalt.err (!%p2136_p13)
}
 0x156   : > { %s2184_s24 = smov 128   ;;  %s2185_s26 = smov 8  }
 0x157   : > { %1522 = dma.vmem_to_hbm [thread:$0]  (%p3143_p11), %s3087_s27, 16384, %s3085_s10, %s1290_s2, %s2184_s24, %s2184_s24, %s2185_s26  }
 0x158 PF: > { %s1318_s30 = sand.u32 1, %s2166_s6   ;;  %p3144_p8 = scmp.ne.s32.totalorder %s3141_s19, 0 }
 0x159   : > { %p3145_p10 = scmp.ge.s32.totalorder %s2178_s9, 2  ;;  %s1319_s17 = scalar_lea.sflag [#allocation4], %s1318_s30 }
 0x15b   : > { %p1529_p0 = pnand %p3145_p10, %p3144_p8 }
 0x15d   : > { %2161 = dma.done.wait (!%p1529_p0), %s1319_s17, 16384  }
 0x15e   : > { %2163 = vsyncadd (!%p1529_p0), %s1319_s17, 4294950912  ;;  %p14_p2 = scmp.ge.s32.totalorder %s2221_s12, 4   ;;  %s3146_s6 = smov %s2170_s7 }
 0x15f   : > { %s3147_s7 = smov %s2174_s8  ;;  %s3148_s8 = smov %s2233_s15 }
 0x160   : > { %s3149_s9 = smov %s2221_s12  ;;  %16 = sbr.rel (!%p14_p2) target bundleno = 5 (0x5), region = 69 }
 0x167   :  { %1324 = vsyncpa [#allocation3], 1 }
 0x168   :  { %1326 = vsyncpa [#allocation3 + $0x1], 1 }
 0x169   :  { %1327 = vsyncpa [#allocation4], 1 }
 0x16a   :  { %1329 = vsyncpa [#allocation4 + $0x1], 1 }

</bundles_post_ra>
